<compile_context>
chip_gen: v7x
topology: tpu7x:2x2x1
jax: 0.10.0
libtpu: 0.0.40
codegen_flags: <defaults>
</compile_context>

<pallas_src>
import jax
import jax.numpy as jnp
import numpy as np
from jax import lax
from jax.experimental import pallas as pl
from jax.experimental.pallas import tpu as pltpu

NEG_INF = -1e30
EPS = 1e-13
LANE = 128


def _masked_softmax(logits, mask, axis):
    """AllenNLP-style masked_softmax restricted to positions where mask==1."""
    masked = jnp.where(mask > 0, logits, NEG_INF)
    m = jnp.max(masked, axis=axis, keepdims=True)
    e = jnp.exp(masked - m) * mask
    return e / (jnp.sum(e, axis=axis, keepdims=True) + EPS)


def biattention_kernel(x_ref, y_ref, m_ref, watt_ref,
                       wx_ref, bwx_ref, wy_ref, bwy_ref, out_ref):
    f32 = jnp.float32
    bf16 = jnp.bfloat16
    Bb, Tx, D = x_ref.shape
    _, Ty, _ = y_ref.shape
    Hpx = wx_ref.shape[2]
    Hpy = wy_ref.shape[2]

    x = x_ref[...]                        # (Bb, Tx, D)  bf16
    y = y_ref[...]                        # (Bb, Ty, D)  bf16
    xm = m_ref[:, :Tx, :]                 # (Bb, Tx, 1)  f32 mask, column form
    ym = m_ref[:, Tx:, :]                 # (Bb, Ty, 1)  f32 mask, column form

    # LinearMatrixAttention with combination='x,y' gives an additive score
    #   att[b,i,j] = x[b,i].w_x + y[b,j].w_y + b_att
    # so softmax over i cancels every j-dependent (and constant) term and
    # vice versa: both attention maps are rank-1 and both contexts collapse
    # to one pooled vector per batch row.  b_att cancels exactly.
    wax = watt_ref[0:1, :].reshape(1, 1, D)                 # f32
    way = watt_ref[1:2, :].reshape(1, 1, D)
    sx = jnp.sum(x * wax, axis=-1, keepdims=True)           # (Bb, Tx, 1) f32
    sy = jnp.sum(y * way, axis=-1, keepdims=True)           # (Bb, Ty, 1) f32
    px = _masked_softmax(sx, xm, axis=1)                    # (Bb, Tx, 1)
    py = _masked_softmax(sy, ym, axis=1)                    # (Bb, Ty, 1)
    cx = jnp.sum(px * x, axis=1)                            # (Bb, D) f32 = context_x
    cy = jnp.sum(py * y, axis=1)                            # (Bb, D) f32 = context_y

    def integrate_and_pool(s, ctx, w_ref, bw_ref, mask, T, Hp):
        # concat([s, s-c, s*c]) @ [W1;W2;W3] + b
        #   == s@(W1+W2) + (s*c)@W3 + (b - c@W2)
        # where c is constant along the sequence axis (rank-1 context), so the
        # c@W2 correction is one tiny (Bb,D)x(D,Hp) dot per side.
        bias = bw_ref[0:1, :]                                # (1, Hp)  integrator bias
        w_pool = bw_ref[1:2, :].reshape(1, 1, Hp)            # pooling projection
        ctx3 = ctx.reshape(Bb, 1, D)
        s2 = s.reshape(Bb * T, D)                            # bf16, layout-preserving
        sc2 = (s * ctx3).reshape(Bb * T, D).astype(bf16)     # bf16
        corr = bias - jnp.dot(ctx.astype(bf16), w_ref[2],
                              preferred_element_type=f32)    # (Bb, Hp)
        h = (jnp.dot(s2, w_ref[0], preferred_element_type=f32)
             + jnp.dot(sc2, w_ref[1], preferred_element_type=f32))
        h = h.reshape(Bb, T, Hp) + corr.reshape(Bb, 1, Hp)   # (Bb, T, Hp)
        # attentive pooling; the pooling bias is a constant logit shift and
        # cancels inside masked_softmax, so it is not needed here.
        logit = jnp.sum(h * w_pool, axis=-1, keepdims=True)  # (Bb, T, 1)
        p = _masked_softmax(logit, mask, axis=1)             # (Bb, T, 1)
        return jnp.sum(h * p, axis=1)                        # (Bb, Hp)

    ox = integrate_and_pool(x, cy, wx_ref, bwx_ref, xm, Tx, Hpx)
    oy = integrate_and_pool(y, cx, wy_ref, bwy_ref, ym, Ty, Hpy)

    # single lane-dense store: both slice offsets are multiples of 128 lanes.
    out_ref[:, :Hpx] = ox
    out_ref[:, Hpx:] = oy


def _round_up(v, m):
    return ((v + m - 1) // m) * m


def _tpu_hw_info():
    """(tensorcores_per_chip, vmem_limit_bytes or None) — generation aware."""
    try:
        kind = jax.devices()[0].device_kind.lower()
    except Exception:
        kind = ""
    if "v7" in kind or "7x" in kind:
        return 2, 48 * 1024 * 1024          # 2 TCs, 64 MiB physical VMEM
    if "v5" in kind or "v6" in kind:
        return 1, 64 * 1024 * 1024          # single TC, 128 MiB physical VMEM
    return 1, None                          # unknown part: leave default limit


def biattention_forward(params, x, y, x_mask, y_mask, block_b=None):
    f32 = jnp.float32
    bf16 = jnp.bfloat16
    B, Tx, D = x.shape
    _, Ty, _ = y.shape
    Hx = params["w_ix"].shape[1]
    Hy = params["w_iy"].shape[1]
    Hpx = _round_up(Hx, LANE)
    Hpy = _round_up(Hy, LANE)

    # ---- pack / fold parameters (one-time, wrapper side) --------------------
    def pad_h(a, hp):
        return jnp.pad(a, ((0, 0), (0, hp - a.shape[1])))

    def pack_side(w_i, b_i, w_l, hp):
        w1, w2, w3 = w_i[:D], w_i[D:2 * D], w_i[2 * D:]
        wstack = jnp.stack([pad_h(w1 + w2, hp), pad_h(w3, hp),
                            pad_h(w2, hp)]).astype(bf16)      # (3, D, hp)
        bw = jnp.concatenate([pad_h(b_i, hp), pad_h(w_l.T, hp)],
                             axis=0).astype(f32)              # (2, hp)
        return wstack, bw

    wx_stack, bwx = pack_side(params["w_ix"], params["b_ix"], params["w_lx"], Hpx)
    wy_stack, bwy = pack_side(params["w_iy"], params["b_iy"], params["w_ly"], Hpy)
    w_att = jnp.concatenate([params["w_att_x"].T, params["w_att_y"].T],
                            axis=0).astype(f32)               # (2, D)
    # b_att / b_lx / b_ly cancel inside masked_softmax -> not passed at all.

    # ---- pad sequence lengths to sublane multiples (8) -----------------------
    Txp = _round_up(Tx, 8)
    Typ = _round_up(Ty, 8)
    xb = x.astype(bf16)
    yb = y.astype(bf16)
    xmf = x_mask.astype(f32)
    ymf = y_mask.astype(f32)
    if Txp != Tx:
        xb = jnp.pad(xb, ((0, 0), (0, Txp - Tx), (0, 0)))
        xmf = jnp.pad(xmf, ((0, 0), (0, Txp - Tx)))
    if Typ != Ty:
        yb = jnp.pad(yb, ((0, 0), (0, Typ - Ty), (0, 0)))
        ymf = jnp.pad(ymf, ((0, 0), (0, Typ - Ty)))

    # ---- generation-aware, VMEM-budgeted batch blocking ----------------------
    ncores, vmem_limit = _tpu_hw_info()
    if block_b is None:
        budget = (vmem_limit or (32 << 20)) // 2   # leave headroom for temps
        per_b = (2 * (Txp + Typ) * D * 2           # x/y bf16, double-buffered
                 + 2 * (Txp + Typ) * 4             # packed column masks
                 + 2 * (Hpx + Hpy) * 4             # output tile
                 + (Txp + Typ) * D * 8             # f32 elementwise temporaries
                 + (Txp * Hpx + Typ * Hpy) * 8)    # integrator activations
        block_b = min(B, max(8, int(budget // per_b)), 512)
        if ncores > 1 and B >= 16:
            # v7x: keep >=2 grid steps so both TensorCores get work
            block_b = min(block_b, -(-B // 2))
    if block_b < B:
        block_b = max(8, (block_b // 8) * 8)       # output-block sublane tiling
    if block_b >= B:
        block_b = B                                # single fat step (v5e/v6e)
    nb = -(-B // block_b)
    Bp = nb * block_b
    if Bp != B:  # padded batch rows are fully masked -> pooled outputs are 0
        xb = jnp.pad(xb, ((0, Bp - B), (0, 0), (0, 0)))
        yb = jnp.pad(yb, ((0, Bp - B), (0, 0), (0, 0)))
        xmf = jnp.pad(xmf, ((0, Bp - B), (0, 0)))
        ymf = jnp.pad(ymf, ((0, Bp - B), (0, 0)))

    # one packed mask stream, column form; slice offsets are sublane-aligned.
    masks = jnp.concatenate([xmf, ymf], axis=1)[:, :, None]   # (Bp, Txp+Typ, 1)

    def batched(shape):
        nd = len(shape)
        return pl.BlockSpec(shape, lambda b, _nd=nd: (b,) + (0,) * (_nd - 1))

    def const(arr):
        nd = arr.ndim
        return pl.BlockSpec(arr.shape, lambda b, _nd=nd: (0,) * _nd)

    out = pl.pallas_call(
        biattention_kernel,
        out_shape=jax.ShapeDtypeStruct((Bp, Hpx + Hpy), f32),
        grid=(nb,),
        in_specs=[
            batched((block_b, Txp, D)),
            batched((block_b, Typ, D)),
            batched((block_b, Txp + Typ, 1)),
            const(w_att), const(wx_stack), const(bwx),
            const(wy_stack), const(bwy),
        ],
        out_specs=pl.BlockSpec((block_b, Hpx + Hpy), lambda b: (b, 0)),
        compiler_params=pltpu.CompilerParams(
            dimension_semantics=("parallel",),
            vmem_limit_bytes=vmem_limit),
    )(xb, yb, masks, w_att, wx_stack, bwx, wy_stack, bwy)

    # slice the lane padding off and concatenate the two pooled vectors.
    return jnp.concatenate([out[:B, :Hx], out[:B, Hpx:Hpx + Hy]], axis=-1)


def reference_forward(params, x, y, x_mask, y_mask):
    """Pure-JAX reference mirroring the PyTorch forward semantics."""
    hp = lax.Precision.HIGHEST
    xm = x_mask.astype(jnp.float32)  # (B, Tx)
    ym = y_mask.astype(jnp.float32)  # (B, Ty)

    sx = jnp.einsum("btd,do->bto", x, params["w_att_x"], precision=hp)   # (B,Tx,1)
    sy = jnp.einsum("bsd,do->bso", y, params["w_att_y"], precision=hp)   # (B,Ty,1)
    att = sx + jnp.swapaxes(sy, 1, 2) + params["b_att"][0, 0]            # (B,Tx,Ty)

    wX = _masked_softmax(att, xm[:, :, None], axis=1)
    context_x = jnp.einsum("bts,btd->bsd", wX, x, precision=hp)          # (B,Ty,D)
    wY = _masked_softmax(att, ym[:, None, :], axis=2)
    context_y = jnp.einsum("bts,bsd->btd", wY, y, precision=hp)          # (B,Tx,D)

    xay = jnp.concatenate([x, x - context_y, x * context_y], axis=2)
    yax = jnp.concatenate([y, y - context_x, y * context_x], axis=2)

    hx = jnp.einsum("btk,kh->bth", xay, params["w_ix"], precision=hp) + params["b_ix"][0]
    hy = jnp.einsum("btk,kh->bth", yax, params["w_iy"], precision=hp) + params["b_iy"][0]

    lx = jnp.einsum("bth,ho->bto", hx, params["w_lx"], precision=hp) + params["b_lx"][0, 0]
    px = _masked_softmax(lx, xm[:, :, None], axis=1)
    ox = jnp.sum(hx * px, axis=1)

    ly = jnp.einsum("bth,ho->bto", hy, params["w_ly"], precision=hp) + params["b_ly"][0, 0]
    py = _masked_softmax(ly, ym[:, :, None], axis=1)
    oy = jnp.sum(hy * py, axis=1)

    return jnp.concatenate([ox, oy], axis=1)


if __name__ == "__main__":
    B, Tx, Ty, D, Hx, Hy = 4, 8, 16, 32, 16, 16

    key = jax.random.PRNGKey(0)
    keys = jax.random.split(key, 12)

    x = jax.random.normal(keys[0], (B, Tx, D), jnp.float32)
    y = jax.random.normal(keys[1], (B, Ty, D), jnp.float32)

    # masks: first `len` positions valid; includes one fully-masked x sequence
    x_len = jnp.array([Tx, 5, 0, 3])
    y_len = jnp.array([Ty, 11, 7, Ty])
    x_mask = (jnp.arange(Tx)[None, :] < x_len[:, None]).astype(jnp.float32)  # (B, Tx)
    y_mask = (jnp.arange(Ty)[None, :] < y_len[:, None]).astype(jnp.float32)  # (B, Ty)

    s = 0.1
    params = {
        "w_att_x": s * jax.random.normal(keys[2], (D, 1), jnp.float32),
        "w_att_y": s * jax.random.normal(keys[3], (D, 1), jnp.float32),
        "b_att":   s * jax.random.normal(keys[4], (1, 1), jnp.float32),
        "w_ix":    s * jax.random.normal(keys[5], (3 * D, Hx), jnp.float32),
        "b_ix":    s * jax.random.normal(keys[6], (1, Hx), jnp.float32),
        "w_iy":    s * jax.random.normal(keys[7], (3 * D, Hy), jnp.float32),
        "b_iy":    s * jax.random.normal(keys[8], (1, Hy), jnp.float32),
        "w_lx":    s * jax.random.normal(keys[9], (Hx, 1), jnp.float32),
        "b_lx":    jnp.zeros((1, 1), jnp.float32),
        "w_ly":    s * jax.random.normal(keys[10], (Hy, 1), jnp.float32),
        "b_ly":    jnp.zeros((1, 1), jnp.float32),
    }

    out = biattention_forward(params, x, y, x_mask, y_mask)
    out = jax.block_until_ready(out)

    ref = reference_forward(params, x, y, x_mask, y_mask)
    assert out.shape == (B, Hx + Hy)
    assert bool(jnp.all(jnp.isfinite(out)))
    # bf16 inputs + bf16 MXU operands with f32 accumulation -> bf16-class tolerance.
    np.testing.assert_allclose(np.asarray(out), np.asarray(ref), rtol=2e-2, atol=2e-2)

    print("KERNEL_OK")
</pallas_src>

<mosaic_0001>
module attributes {stable_mosaic.version = 11 : i64} {
  func.func @biattention_kernel(%arg0: i32, %arg1: memref<4x8x32xbf16, #tpu.memory_space<vmem>>, %arg2: memref<4x16x32xbf16, #tpu.memory_space<vmem>>, %arg3: memref<4x24x1xf32, #tpu.memory_space<vmem>>, %arg4: memref<2x32xf32, #tpu.memory_space<vmem>>, %arg5: memref<3x32x128xbf16, #tpu.memory_space<vmem>>, %arg6: memref<2x128xf32, #tpu.memory_space<vmem>>, %arg7: memref<3x32x128xbf16, #tpu.memory_space<vmem>>, %arg8: memref<2x128xf32, #tpu.memory_space<vmem>>, %arg9: memref<4x256xf32, #tpu.memory_space<vmem>>) attributes {dimension_semantics = [#tpu.dimension_semantics<parallel>], iteration_bounds = array<i64: 1>, scalar_prefetch = 0 : i64, scratch_operands = 0 : i64, tpu.core_type = #tpu.core_type<tc>, window_params = [{transform_indices = @transform_0, window_bounds = array<i64: 4, 8, 32>}, {transform_indices = @transform_1, window_bounds = array<i64: 4, 16, 32>}, {transform_indices = @transform_2, window_bounds = array<i64: 4, 24, 1>}, {pipeline_mode = #tpu.pipeline_mode<synchronous>, transform_indices = @transform_3, window_bounds = array<i64: 2, 32>}, {pipeline_mode = #tpu.pipeline_mode<synchronous>, transform_indices = @transform_4, window_bounds = array<i64: 3, 32, 128>}, {pipeline_mode = #tpu.pipeline_mode<synchronous>, transform_indices = @transform_5, window_bounds = array<i64: 2, 128>}, {pipeline_mode = #tpu.pipeline_mode<synchronous>, transform_indices = @transform_6, window_bounds = array<i64: 3, 32, 128>}, {pipeline_mode = #tpu.pipeline_mode<synchronous>, transform_indices = @transform_7, window_bounds = array<i64: 2, 128>}, {transform_indices = @transform_8, window_bounds = array<i64: 4, 256>}]} {
    %c0 = arith.constant 0 : index
    %c0_0 = arith.constant 0 : index
    %c0_1 = arith.constant 0 : index
    %0 = vector.load %arg1[%c0, %c0_0, %c0_1] : memref<4x8x32xbf16, #tpu.memory_space<vmem>>, vector<4x8x32xbf16>
    %c0_2 = arith.constant 0 : index
    %c0_3 = arith.constant 0 : index
    %c0_4 = arith.constant 0 : index
    %1 = vector.load %arg2[%c0_2, %c0_3, %c0_4] : memref<4x16x32xbf16, #tpu.memory_space<vmem>>, vector<4x16x32xbf16>
    %c0_5 = arith.constant 0 : index
    %c0_6 = arith.constant 0 : index
    %c0_7 = arith.constant 0 : index
    %2 = vector.load %arg3[%c0_5, %c0_6, %c0_7] : memref<4x24x1xf32, #tpu.memory_space<vmem>>, vector<4x8x1xf32>
    %c0_8 = arith.constant 0 : index
    %c8 = arith.constant 8 : index
    %c0_9 = arith.constant 0 : index
    %3 = vector.load %arg3[%c0_8, %c8, %c0_9] : memref<4x24x1xf32, #tpu.memory_space<vmem>>, vector<4x16x1xf32>
    %c0_10 = arith.constant 0 : index
    %c0_11 = arith.constant 0 : index
    %4 = vector.load %arg4[%c0_10, %c0_11] : memref<2x32xf32, #tpu.memory_space<vmem>>, vector<1x32xf32>
    %5 = vector.shape_cast %4 : vector<1x32xf32> to vector<1x1x32xf32>
    %c1 = arith.constant 1 : index
    %c0_12 = arith.constant 0 : index
    %6 = vector.load %arg4[%c1, %c0_12] : memref<2x32xf32, #tpu.memory_space<vmem>>, vector<1x32xf32>
    %7 = vector.shape_cast %6 : vector<1x32xf32> to vector<1x1x32xf32>
    %8 = arith.extf %0 : vector<4x8x32xbf16> to vector<4x8x32xf32>
    %9 = vector.broadcast %5 : vector<1x1x32xf32> to vector<4x8x32xf32>
    %10 = arith.mulf %8, %9 : vector<4x8x32xf32>
    %cst = arith.constant dense<0.000000e+00> : vector<4x8xf32>
    %11 = vector.multi_reduction <add>, %10, %cst [2] : vector<4x8x32xf32> to vector<4x8xf32>
    %12 = vector.shape_cast %11 : vector<4x8xf32> to vector<4x8x1xf32>
    %13 = arith.extf %1 : vector<4x16x32xbf16> to vector<4x16x32xf32>
    %14 = vector.broadcast %7 : vector<1x1x32xf32> to vector<4x16x32xf32>
    %15 = arith.mulf %13, %14 : vector<4x16x32xf32>
    %cst_13 = arith.constant dense<0.000000e+00> : vector<4x16xf32>
    %16 = vector.multi_reduction <add>, %15, %cst_13 [2] : vector<4x16x32xf32> to vector<4x16xf32>
    %17 = vector.shape_cast %16 : vector<4x16xf32> to vector<4x16x1xf32>
    %cst_14 = arith.constant 0.000000e+00 : f32
    %18 = vector.broadcast %cst_14 : f32 to vector<4x8x1xf32>
    %19 = arith.cmpf ogt, %2, %18 : vector<4x8x1xf32>
    %cst_15 = arith.constant -1.000000e+30 : f32
    %20 = vector.broadcast %cst_15 : f32 to vector<4x8x1xf32>
    %21 = arith.select %19, %12, %20 : vector<4x8x1xi1>, vector<4x8x1xf32>
    %cst_16 = arith.constant dense<0xFF800000> : vector<4x1xf32>
    %22 = vector.multi_reduction <maximumf>, %21, %cst_16 [1] : vector<4x8x1xf32> to vector<4x1xf32>
    %23 = vector.shape_cast %22 : vector<4x1xf32> to vector<4x1x1xf32>
    %24 = vector.broadcast %23 : vector<4x1x1xf32> to vector<4x8x1xf32>
    %25 = arith.subf %21, %24 : vector<4x8x1xf32>
    %26 = math.exp %25 : vector<4x8x1xf32>
    %27 = arith.mulf %26, %2 : vector<4x8x1xf32>
    %cst_17 = arith.constant dense<0.000000e+00> : vector<4x1xf32>
    %28 = vector.multi_reduction <add>, %27, %cst_17 [1] : vector<4x8x1xf32> to vector<4x1xf32>
    %29 = vector.shape_cast %28 : vector<4x1xf32> to vector<4x1x1xf32>
    %cst_18 = arith.constant 9.99999982E-14 : f32
    %30 = vector.broadcast %cst_18 : f32 to vector<4x1x1xf32>
    %31 = arith.addf %29, %30 : vector<4x1x1xf32>
    %32 = vector.broadcast %31 : vector<4x1x1xf32> to vector<4x8x1xf32>
    %33 = arith.divf %27, %32 : vector<4x8x1xf32>
    %cst_19 = arith.constant 0.000000e+00 : f32
    %34 = vector.broadcast %cst_19 : f32 to vector<4x16x1xf32>
    %35 = arith.cmpf ogt, %3, %34 : vector<4x16x1xf32>
    %cst_20 = arith.constant -1.000000e+30 : f32
    %36 = vector.broadcast %cst_20 : f32 to vector<4x16x1xf32>
    %37 = arith.select %35, %17, %36 : vector<4x16x1xi1>, vector<4x16x1xf32>
    %cst_21 = arith.constant dense<0xFF800000> : vector<4x1xf32>
    %38 = vector.multi_reduction <maximumf>, %37, %cst_21 [1] : vector<4x16x1xf32> to vector<4x1xf32>
    %39 = vector.shape_cast %38 : vector<4x1xf32> to vector<4x1x1xf32>
    %40 = vector.broadcast %39 : vector<4x1x1xf32> to vector<4x16x1xf32>
    %41 = arith.subf %37, %40 : vector<4x16x1xf32>
    %42 = math.exp %41 : vector<4x16x1xf32>
    %43 = arith.mulf %42, %3 : vector<4x16x1xf32>
    %cst_22 = arith.constant dense<0.000000e+00> : vector<4x1xf32>
    %44 = vector.multi_reduction <add>, %43, %cst_22 [1] : vector<4x16x1xf32> to vector<4x1xf32>
    %45 = vector.shape_cast %44 : vector<4x1xf32> to vector<4x1x1xf32>
    %cst_23 = arith.constant 9.99999982E-14 : f32
    %46 = vector.broadcast %cst_23 : f32 to vector<4x1x1xf32>
    %47 = arith.addf %45, %46 : vector<4x1x1xf32>
    %48 = vector.broadcast %47 : vector<4x1x1xf32> to vector<4x16x1xf32>
    %49 = arith.divf %43, %48 : vector<4x16x1xf32>
    %50 = arith.extf %0 : vector<4x8x32xbf16> to vector<4x8x32xf32>
    %51 = vector.broadcast %33 : vector<4x8x1xf32> to vector<4x8x32xf32>
    %52 = arith.mulf %51, %50 : vector<4x8x32xf32>
    %cst_24 = arith.constant dense<0.000000e+00> : vector<4x32xf32>
    %53 = vector.multi_reduction <add>, %52, %cst_24 [1] : vector<4x8x32xf32> to vector<4x32xf32>
    %54 = arith.extf %1 : vector<4x16x32xbf16> to vector<4x16x32xf32>
    %55 = vector.broadcast %49 : vector<4x16x1xf32> to vector<4x16x32xf32>
    %56 = arith.mulf %55, %54 : vector<4x16x32xf32>
    %cst_25 = arith.constant dense<0.000000e+00> : vector<4x32xf32>
    %57 = vector.multi_reduction <add>, %56, %cst_25 [1] : vector<4x16x32xf32> to vector<4x32xf32>
    %c0_26 = arith.constant 0 : index
    %c0_27 = arith.constant 0 : index
    %58 = vector.load %arg6[%c0_26, %c0_27] : memref<2x128xf32, #tpu.memory_space<vmem>>, vector<1x128xf32>
    %c1_28 = arith.constant 1 : index
    %c0_29 = arith.constant 0 : index
    %59 = vector.load %arg6[%c1_28, %c0_29] : memref<2x128xf32, #tpu.memory_space<vmem>>, vector<1x128xf32>
    %60 = vector.shape_cast %59 : vector<1x128xf32> to vector<1x1x128xf32>
    %61 = vector.shape_cast %57 : vector<4x32xf32> to vector<4x1x32xf32>
    %62 = vector.shape_cast %0 : vector<4x8x32xbf16> to vector<32x32xbf16>
    %63 = arith.extf %0 : vector<4x8x32xbf16> to vector<4x8x32xf32>
    %64 = vector.broadcast %61 : vector<4x1x32xf32> to vector<4x8x32xf32>
    %65 = arith.mulf %63, %64 : vector<4x8x32xf32>
    %66 = vector.shape_cast %65 : vector<4x8x32xf32> to vector<32x32xf32>
    %67 = arith.truncf %66 : vector<32x32xf32> to vector<32x32xbf16>
    %68 = arith.truncf %57 : vector<4x32xf32> to vector<4x32xbf16>
    %c2 = arith.constant 2 : index
    %c0_30 = arith.constant 0 : index
    %c0_31 = arith.constant 0 : index
    %69 = vector.load %arg5[%c2, %c0_30, %c0_31] : memref<3x32x128xbf16, #tpu.memory_space<vmem>>, vector<1x32x128xbf16>
    %70 = vector.shape_cast %69 : vector<1x32x128xbf16> to vector<32x128xbf16>
    %cst_32 = arith.constant dense<0.000000e+00> : vector<4x128xf32>
    %71 = tpu.matmul %68, %70, %cst_32 {dimension_numbers = #tpu.dot_dimension_numbers<[1], [0], [0], [1], [0, 0, 1, 1], [], []>} : vector<4x32xbf16>, vector<32x128xbf16>, vector<4x128xf32> -> vector<4x128xf32>
    %72 = vector.broadcast %58 : vector<1x128xf32> to vector<4x128xf32>
    %73 = arith.subf %72, %71 : vector<4x128xf32>
    %c0_33 = arith.constant 0 : index
    %c0_34 = arith.constant 0 : index
    %c0_35 = arith.constant 0 : index
    %74 = vector.load %arg5[%c0_33, %c0_34, %c0_35] : memref<3x32x128xbf16, #tpu.memory_space<vmem>>, vector<1x32x128xbf16>
    %75 = vector.shape_cast %74 : vector<1x32x128xbf16> to vector<32x128xbf16>
    %cst_36 = arith.constant dense<0.000000e+00> : vector<32x128xf32>
    %76 = tpu.matmul %62, %75, %cst_36 {dimension_numbers = #tpu.dot_dimension_numbers<[1], [0], [0], [1], [0, 0, 1, 1], [], []>} : vector<32x32xbf16>, vector<32x128xbf16>, vector<32x128xf32> -> vector<32x128xf32>
    %c1_37 = arith.constant 1 : index
    %c0_38 = arith.constant 0 : index
    %c0_39 = arith.constant 0 : index
    %77 = vector.load %arg5[%c1_37, %c0_38, %c0_39] : memref<3x32x128xbf16, #tpu.memory_space<vmem>>, vector<1x32x128xbf16>
    %78 = vector.shape_cast %77 : vector<1x32x128xbf16> to vector<32x128xbf16>
    %cst_40 = arith.constant dense<0.000000e+00> : vector<32x128xf32>
    %79 = tpu.matmul %67, %78, %cst_40 {dimension_numbers = #tpu.dot_dimension_numbers<[1], [0], [0], [1], [0, 0, 1, 1], [], []>} : vector<32x32xbf16>, vector<32x128xbf16>, vector<32x128xf32> -> vector<32x128xf32>
    %80 = arith.addf %76, %79 : vector<32x128xf32>
    %81 = vector.shape_cast %80 : vector<32x128xf32> to vector<4x8x128xf32>
    %82 = vector.shape_cast %73 : vector<4x128xf32> to vector<4x1x128xf32>
    %83 = vector.broadcast %82 : vector<4x1x128xf32> to vector<4x8x128xf32>
    %84 = arith.addf %81, %83 : vector<4x8x128xf32>
    %85 = vector.broadcast %60 : vector<1x1x128xf32> to vector<4x8x128xf32>
    %86 = arith.mulf %84, %85 : vector<4x8x128xf32>
    %cst_41 = arith.constant dense<0.000000e+00> : vector<4x8xf32>
    %87 = vector.multi_reduction <add>, %86, %cst_41 [2] : vector<4x8x128xf32> to vector<4x8xf32>
    %88 = vector.shape_cast %87 : vector<4x8xf32> to vector<4x8x1xf32>
    %cst_42 = arith.constant 0.000000e+00 : f32
    %89 = vector.broadcast %cst_42 : f32 to vector<4x8x1xf32>
    %90 = arith.cmpf ogt, %2, %89 : vector<4x8x1xf32>
    %cst_43 = arith.constant -1.000000e+30 : f32
    %91 = vector.broadcast %cst_43 : f32 to vector<4x8x1xf32>
    %92 = arith.select %90, %88, %91 : vector<4x8x1xi1>, vector<4x8x1xf32>
    %cst_44 = arith.constant dense<0xFF800000> : vector<4x1xf32>
    %93 = vector.multi_reduction <maximumf>, %92, %cst_44 [1] : vector<4x8x1xf32> to vector<4x1xf32>
    %94 = vector.shape_cast %93 : vector<4x1xf32> to vector<4x1x1xf32>
    %95 = vector.broadcast %94 : vector<4x1x1xf32> to vector<4x8x1xf32>
    %96 = arith.subf %92, %95 : vector<4x8x1xf32>
    %97 = math.exp %96 : vector<4x8x1xf32>
    %98 = arith.mulf %97, %2 : vector<4x8x1xf32>
    %cst_45 = arith.constant dense<0.000000e+00> : vector<4x1xf32>
    %99 = vector.multi_reduction <add>, %98, %cst_45 [1] : vector<4x8x1xf32> to vector<4x1xf32>
    %100 = vector.shape_cast %99 : vector<4x1xf32> to vector<4x1x1xf32>
    %cst_46 = arith.constant 9.99999982E-14 : f32
    %101 = vector.broadcast %cst_46 : f32 to vector<4x1x1xf32>
    %102 = arith.addf %100, %101 : vector<4x1x1xf32>
    %103 = vector.broadcast %102 : vector<4x1x1xf32> to vector<4x8x1xf32>
    %104 = arith.divf %98, %103 : vector<4x8x1xf32>
    %105 = vector.broadcast %104 : vector<4x8x1xf32> to vector<4x8x128xf32>
    %106 = arith.mulf %84, %105 : vector<4x8x128xf32>
    %cst_47 = arith.constant dense<0.000000e+00> : vector<4x128xf32>
    %107 = vector.multi_reduction <add>, %106, %cst_47 [1] : vector<4x8x128xf32> to vector<4x128xf32>
    %c0_48 = arith.constant 0 : index
    %c0_49 = arith.constant 0 : index
    %108 = vector.load %arg8[%c0_48, %c0_49] : memref<2x128xf32, #tpu.memory_space<vmem>>, vector<1x128xf32>
    %c1_50 = arith.constant 1 : index
    %c0_51 = arith.constant 0 : index
    %109 = vector.load %arg8[%c1_50, %c0_51] : memref<2x128xf32, #tpu.memory_space<vmem>>, vector<1x128xf32>
    %110 = vector.shape_cast %109 : vector<1x128xf32> to vector<1x1x128xf32>
    %111 = vector.shape_cast %53 : vector<4x32xf32> to vector<4x1x32xf32>
    %112 = vector.shape_cast %1 : vector<4x16x32xbf16> to vector<64x32xbf16>
    %113 = arith.extf %1 : vector<4x16x32xbf16> to vector<4x16x32xf32>
    %114 = vector.broadcast %111 : vector<4x1x32xf32> to vector<4x16x32xf32>
    %115 = arith.mulf %113, %114 : vector<4x16x32xf32>
    %116 = vector.shape_cast %115 : vector<4x16x32xf32> to vector<64x32xf32>
    %117 = arith.truncf %116 : vector<64x32xf32> to vector<64x32xbf16>
    %118 = arith.truncf %53 : vector<4x32xf32> to vector<4x32xbf16>
    %c2_52 = arith.constant 2 : index
    %c0_53 = arith.constant 0 : index
    %c0_54 = arith.constant 0 : index
    %119 = vector.load %arg7[%c2_52, %c0_53, %c0_54] : memref<3x32x128xbf16, #tpu.memory_space<vmem>>, vector<1x32x128xbf16>
    %120 = vector.shape_cast %119 : vector<1x32x128xbf16> to vector<32x128xbf16>
    %cst_55 = arith.constant dense<0.000000e+00> : vector<4x128xf32>
    %121 = tpu.matmul %118, %120, %cst_55 {dimension_numbers = #tpu.dot_dimension_numbers<[1], [0], [0], [1], [0, 0, 1, 1], [], []>} : vector<4x32xbf16>, vector<32x128xbf16>, vector<4x128xf32> -> vector<4x128xf32>
    %122 = vector.broadcast %108 : vector<1x128xf32> to vector<4x128xf32>
    %123 = arith.subf %122, %121 : vector<4x128xf32>
    %c0_56 = arith.constant 0 : index
    %c0_57 = arith.constant 0 : index
    %c0_58 = arith.constant 0 : index
    %124 = vector.load %arg7[%c0_56, %c0_57, %c0_58] : memref<3x32x128xbf16, #tpu.memory_space<vmem>>, vector<1x32x128xbf16>
    %125 = vector.shape_cast %124 : vector<1x32x128xbf16> to vector<32x128xbf16>
    %cst_59 = arith.constant dense<0.000000e+00> : vector<64x128xf32>
    %126 = tpu.matmul %112, %125, %cst_59 {dimension_numbers = #tpu.dot_dimension_numbers<[1], [0], [0], [1], [0, 0, 1, 1], [], []>} : vector<64x32xbf16>, vector<32x128xbf16>, vector<64x128xf32> -> vector<64x128xf32>
    %c1_60 = arith.constant 1 : index
    %c0_61 = arith.constant 0 : index
    %c0_62 = arith.constant 0 : index
    %127 = vector.load %arg7[%c1_60, %c0_61, %c0_62] : memref<3x32x128xbf16, #tpu.memory_space<vmem>>, vector<1x32x128xbf16>
    %128 = vector.shape_cast %127 : vector<1x32x128xbf16> to vector<32x128xbf16>
    %cst_63 = arith.constant dense<0.000000e+00> : vector<64x128xf32>
    %129 = tpu.matmul %117, %128, %cst_63 {dimension_numbers = #tpu.dot_dimension_numbers<[1], [0], [0], [1], [0, 0, 1, 1], [], []>} : vector<64x32xbf16>, vector<32x128xbf16>, vector<64x128xf32> -> vector<64x128xf32>
    %130 = arith.addf %126, %129 : vector<64x128xf32>
    %131 = vector.shape_cast %130 : vector<64x128xf32> to vector<4x16x128xf32>
    %132 = vector.shape_cast %123 : vector<4x128xf32> to vector<4x1x128xf32>
    %133 = vector.broadcast %132 : vector<4x1x128xf32> to vector<4x16x128xf32>
    %134 = arith.addf %131, %133 : vector<4x16x128xf32>
    %135 = vector.broadcast %110 : vector<1x1x128xf32> to vector<4x16x128xf32>
    %136 = arith.mulf %134, %135 : vector<4x16x128xf32>
    %cst_64 = arith.constant dense<0.000000e+00> : vector<4x16xf32>
    %137 = vector.multi_reduction <add>, %136, %cst_64 [2] : vector<4x16x128xf32> to vector<4x16xf32>
    %138 = vector.shape_cast %137 : vector<4x16xf32> to vector<4x16x1xf32>
    %cst_65 = arith.constant 0.000000e+00 : f32
    %139 = vector.broadcast %cst_65 : f32 to vector<4x16x1xf32>
    %140 = arith.cmpf ogt, %3, %139 : vector<4x16x1xf32>
    %cst_66 = arith.constant -1.000000e+30 : f32
    %141 = vector.broadcast %cst_66 : f32 to vector<4x16x1xf32>
    %142 = arith.select %140, %138, %141 : vector<4x16x1xi1>, vector<4x16x1xf32>
    %cst_67 = arith.constant dense<0xFF800000> : vector<4x1xf32>
    %143 = vector.multi_reduction <maximumf>, %142, %cst_67 [1] : vector<4x16x1xf32> to vector<4x1xf32>
    %144 = vector.shape_cast %143 : vector<4x1xf32> to vector<4x1x1xf32>
    %145 = vector.broadcast %144 : vector<4x1x1xf32> to vector<4x16x1xf32>
    %146 = arith.subf %142, %145 : vector<4x16x1xf32>
    %147 = math.exp %146 : vector<4x16x1xf32>
    %148 = arith.mulf %147, %3 : vector<4x16x1xf32>
    %cst_68 = arith.constant dense<0.000000e+00> : vector<4x1xf32>
    %149 = vector.multi_reduction <add>, %148, %cst_68 [1] : vector<4x16x1xf32> to vector<4x1xf32>
    %150 = vector.shape_cast %149 : vector<4x1xf32> to vector<4x1x1xf32>
    %cst_69 = arith.constant 9.99999982E-14 : f32
    %151 = vector.broadcast %cst_69 : f32 to vector<4x1x1xf32>
    %152 = arith.addf %150, %151 : vector<4x1x1xf32>
    %153 = vector.broadcast %152 : vector<4x1x1xf32> to vector<4x16x1xf32>
    %154 = arith.divf %148, %153 : vector<4x16x1xf32>
    %155 = vector.broadcast %154 : vector<4x16x1xf32> to vector<4x16x128xf32>
    %156 = arith.mulf %134, %155 : vector<4x16x128xf32>
    %cst_70 = arith.constant dense<0.000000e+00> : vector<4x128xf32>
    %157 = vector.multi_reduction <add>, %156, %cst_70 [1] : vector<4x16x128xf32> to vector<4x128xf32>
    %c0_71 = arith.constant 0 : index
    %c0_72 = arith.constant 0 : index
    %158 = vector.load %arg9[%c0_71, %c0_72] : memref<4x256xf32, #tpu.memory_space<vmem>>, vector<4x128xf32>
    tpu.vector_store %arg9[%c0_71, %c0_72], %107 {strides = array<i32>} : memref<4x256xf32, #tpu.memory_space<vmem>>, vector<4x128xf32>,
    %c0_73 = arith.constant 0 : index
    %c128 = arith.constant 128 : index
    %159 = vector.load %arg9[%c0_73, %c128] : memref<4x256xf32, #tpu.memory_space<vmem>>, vector<4x128xf32>
    tpu.vector_store %arg9[%c0_73, %c128], %157 {strides = array<i32>} : memref<4x256xf32, #tpu.memory_space<vmem>>, vector<4x128xf32>,
    return
  }
  func.func @transform_0(%arg0: i32) -> (i32, i32, i32) {
    %c0_i32 = arith.constant 0 : i32
    %c0_i32_0 = arith.constant 0 : i32
    %c0_i32_1 = arith.constant 0 : i32
    return %arg0, %c0_i32, %c0_i32_0 : i32, i32, i32
  }
  func.func @transform_1(%arg0: i32) -> (i32, i32, i32) {
    %c0_i32 = arith.constant 0 : i32
    %c0_i32_0 = arith.constant 0 : i32
    %c0_i32_1 = arith.constant 0 : i32
    return %arg0, %c0_i32, %c0_i32_0 : i32, i32, i32
  }
  func.func @transform_2(%arg0: i32) -> (i32, i32, i32) {
    %c0_i32 = arith.constant 0 : i32
    %c0_i32_0 = arith.constant 0 : i32
    %c0_i32_1 = arith.constant 0 : i32
    return %arg0, %c0_i32, %c0_i32_0 : i32, i32, i32
  }
  func.func @transform_3(%arg0: i32) -> (i32, i32) {
    %c0_i32 = arith.constant 0 : i32
    %c0_i32_0 = arith.constant 0 : i32
    %c0_i32_1 = arith.constant 0 : i32
    return %c0_i32, %c0_i32_0 : i32, i32
  }
  func.func @transform_4(%arg0: i32) -> (i32, i32, i32) {
    %c0_i32 = arith.constant 0 : i32
    %c0_i32_0 = arith.constant 0 : i32
    %c0_i32_1 = arith.constant 0 : i32
    %c0_i32_2 = arith.constant 0 : i32
    return %c0_i32, %c0_i32_0, %c0_i32_1 : i32, i32, i32
  }
  func.func @transform_5(%arg0: i32) -> (i32, i32) {
    %c0_i32 = arith.constant 0 : i32
    %c0_i32_0 = arith.constant 0 : i32
    %c0_i32_1 = arith.constant 0 : i32
    return %c0_i32, %c0_i32_0 : i32, i32
  }
  func.func @transform_6(%arg0: i32) -> (i32, i32, i32) {
    %c0_i32 = arith.constant 0 : i32
    %c0_i32_0 = arith.constant 0 : i32
    %c0_i32_1 = arith.constant 0 : i32
    %c0_i32_2 = arith.constant 0 : i32
    return %c0_i32, %c0_i32_0, %c0_i32_1 : i32, i32, i32
  }
  func.func @transform_7(%arg0: i32) -> (i32, i32) {
    %c0_i32 = arith.constant 0 : i32
    %c0_i32_0 = arith.constant 0 : i32
    %c0_i32_1 = arith.constant 0 : i32
    return %c0_i32, %c0_i32_0 : i32, i32
  }
  func.func @transform_8(%arg0: i32) -> (i32, i32) {
    %c0_i32 = arith.constant 0 : i32
    %c0_i32_0 = arith.constant 0 : i32
    return %arg0, %c0_i32 : i32, i32
  }
}

</mosaic_0001>

<bundles_post_ra>
// kernel: tpu_custom_call.1
= control target key start
LH: loop header
LB: loop body
LE: loop exit
PB: predicated region body
PF: predicated region fallthrough
CT: control target
= control target key end

     0   :  { %13 = vsyncpa [#allocation3], 0  ;;  %s2672_s0 = inlined_call_operand.hbm [shape: bf16[4,8,32], index: 0, kind: input, shape index: {}]   ;;  %s2673_s1 = inlined_call_operand.hbm [shape: bf16[4,16,32], index: 1, kind: input, shape index: {}]   ;;  %s2674_s2 = inlined_call_operand.vmem [shape: f32[4,24,1], index: 2, kind: input, shape index: {}]   ;;  %s2675_s3 = inlined_call_operand.vmem [shape: f32[2,32], index: 3, kind: input, shape index: {}]   ;;  %s2676_s4 = inlined_call_operand.vmem [shape: bf16[3,32,128], index: 4, kind: input, shape index: {}]   ;;  %s2677_s5 = inlined_call_operand.vmem [shape: f32[2,128], index: 5, kind: input, shape index: {}]   ;;  %s2678_s6 = inlined_call_operand.vmem [shape: bf16[3,32,128], index: 6, kind: input, shape index: {}]   ;;  %s2679_s7 = inlined_call_operand.vmem [shape: f32[2,128], index: 7, kind: input, shape index: {}]   ;;  %s2680_s8 = inlined_call_operand.hbm [shape: f32[4,256], index: 8, kind: output, shape index: {}]  }
   0x1   :  { %14 = vsyncpa [#allocation6], 0 }
   0x2   :  { %15 = vsyncpa [#allocation4], 0  ;;  %s1952_s27 = smov [#allocation2]   ;;  %s1880_s9 = scalar_lea.hbm %s2672_s0, 256 }
   0x3   :  { %s21_s28 = sshll.u32 %s1952_s27, 4  ;;  %p1881_p0 = scmp.ne.s32.totalorder %s2672_s0, %s1880_s9  ;;  %s22_s28 = int_to_ptr.vmem [resolvable:$true] %s21_s28 }
   0x4   :  { %p1884_p1 = scmp.lt.u32.totalorder %s1880_s9, %s2672_s0 }
   0x6   :  { %p1886_p2 = pnand %p1884_p1, %p1881_p0 }
   0x8   :  { %1889 = shalt.err (!%p1886_p2)
}
   0x9   :  { %s1890_s14 = scalar_lea.vmem %s22_s28, 256  ;;  %p1895_p4 = scmp.lt.s32.totalorder %s22_s28, %s22_s28 }
   0xa   :  { %p1891_p3 = scmp.ne.s32.totalorder %s22_s28, %s1890_s14  ;;  %p1896_p5 = scmp.lt.s32.totalorder %s1890_s14, %s1890_s14 }
   0xc   :  { %p1897_p6 = por %p1896_p5, %p1895_p4 }
   0xe   :  { %p1898_p7 = pnand %p1897_p6, %p1891_p3 }
  0x10   :  { %1901 = shalt.err (!%p1898_p7)
}
  0x11   :  { %s1953_s15 = smov 64   ;;  %s1954_s16 = smov 4  }
  0x12   :  { %27 = dma.hbm_to_vmem [thread:$0]  %s2672_s0, 256, %s22_s28, [#allocation3], %s1953_s15, %s1953_s15, %s1954_s16  }
  0x13   :  { %s1955_s19 = smov [#allocation5]   ;;  %s1902_s23 = scalar_lea.hbm %s2673_s1, 512 }
  0x14   :  { %s33_s20 = sshll.u32 %s1955_s19, 4  ;;  %p1903_p8 = scmp.ne.s32.totalorder %s2673_s1, %s1902_s23  ;;  %s34_s20 = int_to_ptr.vmem [resolvable:$true] %s33_s20 }
  0x15   :  { %p1906_p9 = scmp.lt.u32.totalorder %s1902_s23, %s2673_s1 }
  0x17   :  { %p1908_p10 = pnand %p1906_p9, %p1903_p8 }
  0x19   :  { %1911 = shalt.err (!%p1908_p10)
}
  0x1a   :  { %s1912_s29 = scalar_lea.vmem %s34_s20, 512  ;;  %p1917_p12 = scmp.lt.s32.totalorder %s34_s20, %s34_s20 }
  0x1b   :  { %p1913_p11 = scmp.ne.s32.totalorder %s34_s20, %s1912_s29  ;;  %p1918_p13 = scmp.lt.s32.totalorder %s1912_s29, %s1912_s29 }
  0x1d   :  { %p1919_p0 = por %p1918_p13, %p1917_p12 }
  0x1f   :  { %p1920_p1 = pnand %p1919_p0, %p1913_p11 }
  0x21   :  { %1923 = shalt.err (!%p1920_p1)
}
  0x22   :  { %39 = dma.hbm_to_vmem [thread:$0]  %s2673_s1, 512, %s34_s20, [#allocation6], %s1953_s15, %s1953_s15, %s1954_s16  }
  0x23   :  { %1946 = dma.done.wait [#allocation3], 256  }
  0x24   :  { %1947 = vsyncadd [#allocation3], 4294967040 }
  0x25   :  { %1948 = dma.done.wait [#allocation6], 512  }
  0x26   :  { %1949 = vsyncadd [#allocation6], 4294966784  ;;  %v65_v0 = vld [vmem:[#allocation5 + $0x8] sm:$0xff]   ;;  %v1602_v1 = vld [vmem:[%s2675_s3 + $0x1] ss:$0 sm:$0xff]  ;;  %vm97_vm0 = vcmask 261120  }
  0x27   :  { %v63_v2 = vld [vmem:[#allocation5] sm:$0xff]   ;;  %v2033_v3 = vunpack.c.l.bf16 %v65_v0  ;;  %v2037_v5 = vunpack.c.h.bf16 %v65_v0  ;;  %v68_v6 = vld [vmem:[#allocation5 + $0x10] sm:$0xff]   ;;  %v70_v9 = vld [vmem:[#allocation5 + $0x18] sm:$0xff]   ;;  %v1956_v44 = vmov 0   ;;  %vm162_vm5 = vcmask 7168  }
  0x28   :  { %v2035_v4 = vunpack.c.l.bf16 %v63_v2  ;;  %v2039_v7 = vunpack.c.h.bf16 %v63_v2  ;;  %v2041_v8 = vunpack.c.h.bf16 %v68_v6  ;;  %v2046_v13 = vunpack.c.l.bf16 %v68_v6  ;;  %v2059_v23 = vld [vmem:[#allocation2] sm:$0xff]   ;;  %v2074_v31 = vld [vmem:[#allocation2 + $0x8] sm:$0xff]   ;;  %1759 = vset.pattern.permute.xlu1 %v1956_v44  ;;  %1758 = vset.pattern.permute.xlu0 %v1956_v44  ;;  %v2111_v48 = vld [vmem:[%s2674_s2 + $0x10] sm:$0xff] }
  0x29   :  { %v124_v10 = vmul.f32 %v1602_v1, %v2033_v3  ;;  %v125_v12 = vmul.f32 %v1602_v1, %v2037_v5  ;;  %v2051_v17 = vunpack.c.h.bf16 %v70_v9  ;;  %v2053_v18 = vunpack.c.l.bf16 %v70_v9  ;;  %v1601_v28 = vld [vmem:[%s2675_s3] ss:$0 sm:$0xff]  ;;  %v2100_v46 = vld [vmem:[%s2674_s2 + $0x8] sm:$0xff]  ;;  %v2132_v54 = vld [vmem:[%s2674_s2 + $0x38] sm:$0xff] }
  0x2a   :  { %v122_v11 = vmul.f32 %v1602_v1, %v2035_v4  ;;  %v123_v14 = vmul.f32 %v1602_v1, %v2039_v7  ;;  %v127_v21 = vmul.f32 %v1602_v1, %v2041_v8  ;;  %v126_v22 = vmul.f32 %v1602_v1, %v2046_v13  ;;  %v2095_v45 = vld [vmem:[%s2674_s2 + $0x20] sm:$0xff]  ;;  %v2106_v47 = vld [vmem:[%s2674_s2 + $0x28] sm:$0xff]  ;;  %v2160_v9 = vld [vmem:[%s2674_s2 + $0x50] sm:$0xff] }
  0x2b   :  { %v136_v15 = vsel %vm97_vm0, %v124_v10, 0.0  ;;  %v139_v19 = vsel %vm97_vm0, %v125_v12, 0.0  ;;  %v129_v24 = vmul.f32 %v1602_v1, %v2051_v17  ;;  %v128_v25 = vmul.f32 %v1602_v1, %v2053_v18  ;;  %v2123_v52 = vld [vmem:[%s2674_s2 + $0x40] sm:$0xff]  ;;  %v2155_v1 = vld [vmem:[%s2674_s2 + $0x58] sm:$0xff] }
  0x2c   :  { %v130_v16 = vsel %vm97_vm0, %v122_v11, 0.0  ;;  %137 = vadd.xlane.f32.xlu1 %v136_v15  ;;  %v133_v20 = vsel %vm97_vm0, %v123_v14, 0.0  ;;  %v145_v26 = vsel %vm97_vm0, %v127_v21, 0.0  ;;  %v142_v27 = vsel %vm97_vm0, %v126_v22, 0.0  ;;  %v2179_v22 = vld [vmem:[%s2674_s2 + $0x18] sm:$0xff] }
  0x2d   :  { %131 = vadd.xlane.f32.xlu0 %v130_v16  ;;  %v2069_v29 = vunpack.c.h.bf16 %v2059_v23  ;;  %v2072_v30 = vunpack.c.l.bf16 %v2059_v23  ;;  %v151_v32 = vsel %vm97_vm0, %v129_v24, 0.0  ;;  %v148_v33 = vsel %vm97_vm0, %v128_v25, 0.0  ;;  %v2184_v24 = vld [vmem:[%s2674_s2] sm:$0xff] }
  0x2e   :  { %v2081_v36 = vunpack.c.h.bf16 %v2074_v31  ;;  %v2084_v37 = vunpack.c.l.bf16 %v2074_v31  ;;  %vm249_vm1 = vcmp.gt.f32.partialorder %v2095_v45, 0.0  ;;  %vm247_vm2 = vcmp.gt.f32.partialorder %v2100_v46, 0.0 }
  0x2f   :  { %v94_v34 = vmul.f32 %v1601_v28, %v2069_v29  ;;  %v93_v35 = vmul.f32 %v1601_v28, %v2072_v30  ;;  %vm250_vm3 = vcmp.gt.f32.partialorder %v2106_v47, 0.0  ;;  %vm248_vm4 = vcmp.gt.f32.partialorder %v2111_v48, 0.0 }
  0x30   :  { %140 = vadd.xlane.f32.xlu1 %v139_v19  ;;  %v96_v40 = vmul.f32 %v1601_v28, %v2081_v36  ;;  %v95_v41 = vmul.f32 %v1601_v28, %v2084_v37  ;;  %vm252_vm6 = vcmp.gt.f32.partialorder %v2123_v52, 0.0  ;;  %vm251_vm7 = vcmp.gt.f32.partialorder %v2132_v54, 0.0 }
  0x31   :  { %134 = vadd.xlane.f32.xlu0 %v133_v20  ;;  %v101_v38 = vsel %vm97_vm0, %v94_v34, 0.0  ;;  %v98_v39 = vsel %vm97_vm0, %v93_v35, 0.0  ;;  %vm254_vm8 = vcmp.gt.f32.partialorder %v2155_v1, 0.0  ;;  %vm253_vm9 = vcmp.gt.f32.partialorder %v2160_v9, 0.0 }
  0x32   :  { %v107_v42 = vsel %vm97_vm0, %v96_v40, 0.0  ;;  %v104_v43 = vsel %vm97_vm0, %v95_v41, 0.0  ;;  %vm155_vm10 = vcmp.gt.f32.partialorder %v2179_v22, 0.0  ;;  %vm154_vm11 = vcmp.gt.f32.partialorder %v2184_v24, 0.0 }
  0x33   :  { %vm1958_vm14 = vmmov 0   ;;  %vm544_vm15 = vcmask 1041409  }
  0x34   :  { %146 = vadd.xlane.f32.xlu1 %v145_v26 }
  0x35   :  { %143 = vadd.xlane.f32.xlu0 %v142_v27 }
  0x38   :  { %152 = vadd.xlane.f32.xlu1 %v151_v32 }
  0x39   :  { %149 = vadd.xlane.f32.xlu0 %v148_v33 }
  0x3c   :  { %102 = vadd.xlane.f32.xlu1 %v101_v38 }
  0x3d   :  { %99 = vadd.xlane.f32.xlu0 %v98_v39 }
  0x40   :  { %108 = vadd.xlane.f32.xlu1 %v107_v42 }
  0x41   :  { %105 = vadd.xlane.f32.xlu0 %v104_v43 }
  0xb9   :  { %v138_v49 = vpop.xlane.xlu1 %137 }
  0xba   :  { %v132_v50 = vpop.xlane.xlu0 %131  ;;  %v2116_v51 = vsel %vm249_vm1, %v138_v49, -1e+30  ;;  %v2203_v49 = vld [vmem:[%s2674_s2 + $0x48] sm:$0xff] }
  0xbb   :  { %v2127_v53 = vsel %vm247_vm2, %v132_v50, -1e+30  ;;  %v272_v55 = vsel %vm162_vm5, %v2116_v51, -inf  ;;  %2684 = vst [vmem:[#allocation11_spill] sm:$0xff] %v2203_v49  ;;  %vm2682_vm12 = vcmp.gt.f32.partialorder %v2203_v49, 0.0 }
  0xbc   :  { %v263_v60 = vsel %vm162_vm5, %v2127_v53, -inf }
  0xbd   :  { %v141_v56 = vpop.xlane.xlu1 %140 }
  0xbe   :  { %v135_v57 = vpop.xlane.xlu0 %134  ;;  %v2138_v58 = vsel %vm250_vm3, %v141_v56, -1e+30 }
  0xbf   :  { %v2142_v59 = vsel %vm248_vm4, %v135_v57, -1e+30  ;;  %v273_v61 = vsel %vm162_vm5, %v2138_v58, -inf }
  0xc0   :  { %v264_v62 = vsel %vm162_vm5, %v2142_v59, -inf  ;;  %v274_v63 = vmax.f32 %v272_v55, %v273_v61 }
  0xc1   :  { %v265_v0 = vmax.f32 %v263_v60, %v264_v62  ;;  %v147_v2 = vpop.xlane.xlu1 %146  ;;  %v2212_v60 = vld [vmem:[%s2674_s2 + $0x30] sm:$0xff] }
  0xc2   :  { %v144_v6 = vpop.xlane.xlu0 %143  ;;  %v275_v10 = vrot.slane %v274_v63, 4  ;;  %v2164_v12 = vsel %vm252_vm6, %v147_v2, -1e+30  ;;  %vm2683_vm13 = vcmp.gt.f32.partialorder %v2212_v60, 0.0 }
  0xc3   :  { %v266_v11 = vrot.slane %v265_v0, 4  ;;  %v2168_v14 = vsel %vm251_vm7, %v144_v6, -1e+30  ;;  %v282_v15 = vsel %vm162_vm5, %v2164_v12, -inf }
  0xc4   :  { %v281_v16 = vsel %vm162_vm5, %v2168_v14, -inf  ;;  %v276_v19 = vmax.f32 %v274_v63, %v275_v10 }
  0xc5   :  { %v267_v20 = vmax.f32 %v265_v0, %v266_v11  ;;  %v283_v21 = vmax.f32 %v281_v16, %v282_v15  ;;  %v153_v25 = vpop.xlane.xlu1 %152 }
  0xc6   :  { %v150_v26 = vpop.xlane.xlu0 %149  ;;  %v277_v27 = vrot.slane %v276_v19, 2  ;;  %v2188_v33 = vsel %vm254_vm8, %v153_v25, -1e+30 }
  0xc7   :  { %v268_v28 = vrot.slane %v267_v20, 2  ;;  %v284_v32 = vrot.slane %v283_v21, 4  ;;  %v291_v34 = vsel %vm162_vm5, %v2188_v33, -inf  ;;  %v2194_v35 = vsel %vm253_vm9, %v150_v26, -1e+30 }
  0xc8   :  { %v278_v38 = vmax.f32 %v276_v19, %v277_v27  ;;  %v290_v41 = vsel %vm162_vm5, %v2194_v35, -inf }
  0xc9   :  { %v269_v39 = vmax.f32 %v267_v20, %v268_v28  ;;  %v285_v40 = vmax.f32 %v283_v21, %v284_v32  ;;  %v292_v42 = vmax.f32 %v290_v41, %v291_v34  ;;  %v103_v43 = vpop.xlane.xlu1 %102 }
  0xca   :  { %v100_v44 = vpop.xlane.xlu0 %99  ;;  %v279_v50 = vrot.slane %v278_v38, 1  ;;  %v2207_v57 = vsel %vm155_vm10, %v103_v43, -1e+30 }
  0xcb   :  { %v270_v55 = vrot.slane %v269_v39, 1  ;;  %v286_v56 = vrot.slane %v285_v40, 2  ;;  %v293_v61 = vrot.slane %v292_v42, 4  ;;  %v170_v62 = vsel %vm162_vm5, %v2207_v57, -inf }
  0xcc   :  { %v2218_v63 = vsel %vm154_vm11, %v100_v44, -1e+30  ;;  %v280_v0 = vmax.f32 %v278_v38, %v279_v50  ;;  %v171_v10 = vrot.slane %v170_v62, 4 }
  0xcd   :  { %v271_v2 = vmax.f32 %v269_v39, %v270_v55  ;;  %v287_v6 = vmax.f32 %v285_v40, %v286_v56  ;;  %v294_v11 = vmax.f32 %v292_v42, %v293_v61  ;;  %v163_v15 = vsel %vm162_vm5, %v2218_v63, -inf  ;;  %v109_v32 = vpop.xlane.xlu1 %108 }
  0xce   :  { %v301_v16 = vsub.f32 %v2116_v51, %v280_v0  ;;  %v302_v19 = vsub.f32 %v2138_v58, %v280_v0  ;;  %v172_v27 = vmax.f32 %v170_v62, %v171_v10  ;;  %v164_v28 = vrot.slane %v163_v15, 4  ;;  %v106_v34 = vpop.xlane.xlu0 %105 }
  0xcf   :  { %v299_v20 = vsub.f32 %v2127_v53, %v271_v2  ;;  %v300_v21 = vsub.f32 %v2142_v59, %v271_v2  ;;  %v288_v25 = vrot.slane %v287_v6, 1  ;;  %v295_v26 = vrot.slane %v294_v11, 2 }
  0xd0   :  { %v311_v38 = vmul.f32 1.442695, %v301_v16  ;;  %v313_v39 = vmul.f32 1.442695, %v302_v19  ;;  %v173_v44 = vrot.slane %v172_v27, 2  ;;  %v165_v51 = vmax.f32 %v163_v15, %v164_v28 }
  0xd1   :  { %v307_v40 = vmul.f32 1.442695, %v299_v20  ;;  %v309_v41 = vmul.f32 1.442695, %v300_v21  ;;  %v289_v42 = vmax.f32 %v287_v6, %v288_v25  ;;  %v296_v43 = vmax.f32 %v294_v11, %v295_v26 }
  0xd2   :  { %1784 = vpow2.f32 %v311_v38  ;;  %v2230_v53 = vsel %vm2682_vm12, %v109_v32, -1e+30  ;;  %v2234_v58 = vsel %vm2683_vm13, %v106_v34, -1e+30  ;;  %v174_v56 = vmax.f32 %v172_v27, %v173_v44 }
  0xd3   :  { %1786 = vpow2.f32 %v313_v39  ;;  %v303_v59 = vsub.f32 %v2168_v14, %v289_v42  ;;  %v304_v50 = vsub.f32 %v2164_v12, %v289_v42  ;;  %v297_v55 = vrot.slane %v296_v43, 1 }
  0xd4   :  { %1788 = vpow2.f32 %v307_v40  ;;  %v166_v61 = vrot.slane %v165_v51, 2  ;;  %v184_v62 = vsel %vm162_vm5, %v2230_v53, -inf  ;;  %v175_v10 = vrot.slane %v174_v56, 1 }
  0xd5   :  { %1790 = vpow2.f32 %v309_v41  ;;  %v315_v0 = vmul.f32 1.442695, %v303_v59  ;;  %v317_v2 = vmul.f32 1.442695, %v304_v50  ;;  %v298_v6 = vmax.f32 %v296_v43, %v297_v55 }
  0xd6   :  { %v167_v11 = vmax.f32 %v165_v51, %v166_v61  ;;  %v185_v15 = vrot.slane %v184_v62, 4  ;;  %v177_v16 = vsel %vm162_vm5, %v2234_v58, -inf  ;;  %v176_v20 = vmax.f32 %v174_v56, %v175_v10 }
  0xd7   :  { %1792 = vpow2.f32 %v315_v0  ;;  %v305_v12 = vsub.f32 %v2194_v35, %v298_v6  ;;  %v306_v14 = vsub.f32 %v2188_v33, %v298_v6  ;;  %v178_v19 = vrot.slane %v177_v16, 4 }
  0xd8   :  { %1794 = vpow2.f32 %v317_v2  ;;  %v168_v21 = vrot.slane %v167_v11, 1  ;;  %v186_v25 = vmax.f32 %v184_v62, %v185_v15  ;;  %v192_v32 = vsub.f32 %v2207_v57, %v176_v20 }
  0xd9   :  { %v319_v26 = vmul.f32 1.442695, %v305_v12  ;;  %v321_v27 = vmul.f32 1.442695, %v306_v14  ;;  %v179_v28 = vmax.f32 %v177_v16, %v178_v19  ;;  %vm546_vm12 = vcmask 1042434  }
  0xda   :  { %v169_v34 = vmax.f32 %v167_v11, %v168_v21  ;;  %v187_v38 = vrot.slane %v186_v25, 2  ;;  %v197_v41 = vmul.f32 1.442695, %v192_v32  ;;  %vm548_vm13 = vcmask 1043459  }
  0xdb   :  { %1796 = vpow2.f32 %v319_v26  ;;  %v180_v39 = vrot.slane %v179_v28, 2 }
  0xdc   :  { %v1785_v40 = vpop.eup %1784  ;;  %1798 = vpow2.f32 %v321_v27  ;;  %v191_v35 = vsub.f32 %v2218_v63, %v169_v34  ;;  %v188_v33 = vmax.f32 %v186_v25, %v187_v38 }
  0xdd   :  { %v1787_v42 = vpop.eup %1786  ;;  %v181_v43 = vmax.f32 %v179_v28, %v180_v39  ;;  %v2247_v44 = vmul.f32 %v1785_v40, %v2095_v45  ;;  %1800 = vpow2.f32 %v197_v41 }
  0xde   :  { %v1789_v51 = vpop.eup %1788  ;;  %v2250_v59 = vmul.f32 %v1787_v42, %v2106_v47  ;;  %v195_v57 = vmul.f32 1.442695, %v191_v35  ;;  %v189_v50 = vrot.slane %v188_v33, 1 }
  0xdf   :  { %v1791_v55 = vpop.eup %1790  ;;  %v182_v56 = vrot.slane %v181_v43, 1  ;;  %v2253_v61 = vmul.f32 %v1789_v51, %v2100_v46  ;;  %v340_v63 = vsel %vm162_vm5, %v2247_v44, 0.0 }
  0xe0   :  { %v341_v62 = vsel %vm162_vm5, %v2250_v59, 0.0  ;;  %1802 = vpow2.f32 %v195_v57  ;;  %v190_v0 = vmax.f32 %v188_v33, %v189_v50  ;;  %v2260_v2 = vmul.f32 %v1791_v55, %v2111_v48 }
  0xe1   :  { %v1793_v6 = vpop.eup %1792  ;;  %v183_v10 = vmax.f32 %v181_v43, %v182_v56  ;;  %v331_v11 = vsel %vm162_vm5, %v2253_v61, 0.0  ;;  %v342_v15 = vadd.f32 %v341_v62, %v340_v63 }
  0xe2   :  { %v1795_v16 = vpop.eup %1794  ;;  %v194_v12 = vsub.f32 %v2230_v53, %v190_v0  ;;  %v332_v14 = vsel %vm162_vm5, %v2260_v2, 0.0  ;;  %v2268_v19 = vmul.f32 %v1793_v6, %v2132_v54 }
  0xe3   :  { %v193_v20 = vsub.f32 %v2234_v58, %v183_v10  ;;  %v333_v21 = vadd.f32 %v332_v14, %v331_v11  ;;  %v343_v25 = vrot.slane %v342_v15, 4  ;;  %v2272_v26 = vmul.f32 %v1795_v16, %v2123_v52 }
  0xe4   :  { %v201_v27 = vmul.f32 1.442695, %v194_v12  ;;  %v349_v28 = vsel %vm162_vm5, %v2268_v19, 0.0 }
  0xe5   :  { %v1797_v32 = vpop.eup %1796  ;;  %v199_v34 = vmul.f32 1.442695, %v193_v20  ;;  %v334_v53 = vrot.slane %v333_v21, 4  ;;  %v344_v38 = vadd.f32 %v343_v25, %v342_v15  ;;  %v350_v39 = vsel %vm162_vm5, %v2272_v26, 0.0 }
  0xe6   :  { %v1799_v40 = vpop.eup %1798  ;;  %1804 = vpow2.f32 %v201_v27  ;;  %v351_v41 = vadd.f32 %v350_v39, %v349_v28  ;;  %v2279_v58 = vmul.f32 %v1797_v32, %v2160_v9 }
  0xe7   :  { %1806 = vpow2.f32 %v199_v34  ;;  %v335_v35 = vadd.f32 %v334_v53, %v333_v21  ;;  %v345_v33 = vrot.slane %v344_v38, 2  ;;  %v2282_v42 = vmul.f32 %v1799_v40, %v2155_v1  ;;  %v1801_v43 = vpop.eup %1800 }
  0xe8   :  { %v352_v51 = vrot.slane %v351_v41, 4  ;;  %v358_v57 = vsel %vm162_vm5, %v2279_v58, 0.0  ;;  %v2287_v56 = vmul.f32 %v1801_v43, %v2179_v22 }
  0xe9   :  { %v336_v50 = vrot.slane %v335_v35, 2  ;;  %v346_v55 = vadd.f32 %v345_v33, %v344_v38  ;;  %v359_v63 = vsel %vm162_vm5, %v2282_v42, 0.0 }
  0xea   :  { %v1803_v62 = vpop.eup %1802  ;;  %v353_v0 = vadd.f32 %v352_v51, %v351_v41  ;;  %v360_v6 = vadd.f32 %v359_v63, %v358_v57  ;;  %v214_v15 = vsel %vm162_vm5, %v2287_v56, 0.0 }
  0xeb   :  { %v337_v10 = vadd.f32 %v336_v50, %v335_v35  ;;  %v347_v11 = vrot.slane %v346_v55, 1  ;;  %v2294_v16 = vmul.f32 %v1803_v62, %v2184_v24  ;;  %v215_v12 = vrot.slane %v214_v15, 4 }
  0xec   :  { %v354_v14 = vrot.slane %v353_v0, 2  ;;  %v361_v20 = vrot.slane %v360_v6, 4 }
  0xed   :  { %v338_v21 = vrot.slane %v337_v10, 1  ;;  %v348_v25 = vadd.f32 %v347_v11, %v346_v55  ;;  %v207_v27 = vsel %vm162_vm5, %v2294_v16, 0.0  ;;  %v216_v28 = vadd.f32 %v215_v12, %v214_v15 }
  0xee   :  { %v355_v32 = vadd.f32 %v354_v14, %v353_v0  ;;  %v362_v34 = vadd.f32 %v361_v20, %v360_v6  ;;  %v208_v41 = vrot.slane %v207_v27, 4 }
  0xef   :  { %v339_v53 = vadd.f32 %v338_v21, %v337_v10  ;;  %v368_v39 = vadd.f32 1e-13, %v348_v25  ;;  %v217_v40 = vrot.slane %v216_v28, 2 }
  0xf0   :  { %v1805_v38 = vpop.eup %1804  ;;  %v356_v43 = vrot.slane %v355_v32, 1  ;;  %v363_v57 = vrot.slane %v362_v34, 2  ;;  %v209_v6 = vadd.f32 %v208_v41, %v207_v27 }
  0xf1   :  { %v1807_v35 = vpop.eup %1806  ;;  %v367_v33 = vadd.f32 1e-13, %v339_v53  ;;  %v206_v51 = vmul.f32 %v1805_v38, %v2203_v49  ;;  %v218_v50 = vadd.f32 %v217_v40, %v216_v28 }
  0xf2   :  { %v2301_v63 = vmul.f32 %v1807_v35, %v2212_v60  ;;  %v357_v10 = vadd.f32 %v356_v43, %v355_v32  ;;  %v364_v11 = vadd.f32 %v363_v57, %v362_v34  ;;  %v210_v38 = vrot.slane %v209_v6, 2 }
  0xf3   :  { %1808 = vrcp.f32 %v367_v33  ;;  %v228_v55 = vsel %vm162_vm5, %v206_v51, 0.0  ;;  %v219_v62 = vrot.slane %v218_v50, 1 }
  0xf4   :  { %v229_v0 = vrot.slane %v228_v55, 4  ;;  %1810 = vrcp.f32 %v368_v39  ;;  %v221_v15 = vsel %vm162_vm5, %v2301_v63, 0.0  ;;  %v369_v28 = vadd.f32 1e-13, %v357_v10 }
  0xf5   :  { %v220_v12 = vadd.f32 %v219_v62, %v218_v50  ;;  %v222_v20 = vrot.slane %v221_v15, 4  ;;  %v365_v53 = vrot.slane %v364_v11, 1  ;;  %v211_v32 = vadd.f32 %v210_v38, %v209_v6 }
  0xf6   :  { %v230_v14 = vadd.f32 %v229_v0, %v228_v55 }
  0xf7   :  { %v236_v21 = vadd.f32 1e-13, %v220_v12  ;;  %v223_v40 = vadd.f32 %v222_v20, %v221_v15  ;;  %v366_v27 = vadd.f32 %v365_v53, %v364_v11  ;;  %v212_v62 = vrot.slane %v211_v32, 1 }
  0xf8   :  { %v231_v25 = vrot.slane %v230_v14, 2 }
  0xf9   :  { %1812 = vrcp.f32 %v236_v21  ;;  %v224_v34 = vrot.slane %v223_v40, 2  ;;  %v370_v55 = vadd.f32 1e-13, %v366_v27  ;;  %v213_v11 = vadd.f32 %v212_v62, %v211_v32 }
  0xfa   :  { %v232_v35 = vadd.f32 %v231_v25, %v230_v14  ;;  %1814 = vrcp.f32 %v369_v28 }
  0xfb   :  { %v225_v0 = vadd.f32 %v224_v34, %v223_v40  ;;  %v235_v12 = vadd.f32 1e-13, %v213_v11 }
  0xfc   :  { %v233_v33 = vrot.slane %v232_v35, 1 }
  0xfd   :  { %v1809_v49 = vpop.eup %1808 }
  0xfe   :  { %v373_v39 = vmul.f32 %v1809_v49, %v2260_v2  ;;  %v372_v41 = vmul.f32 %v1809_v49, %v2253_v61  ;;  %v234_v43 = vadd.f32 %v233_v33, %v232_v35  ;;  %v1811_v57 = vpop.eup %1810  ;;  %v226_v2 = vrot.slane %v225_v0, 1  ;;  %v1766_v35 = vld [vmem:[%s2676_s4 + $0x28] sm:$0xff]  }
  0xff   :  { %v375_v10 = vmul.f32 %v1811_v57, %v2247_v44  ;;  %v376_v49 = vmul.f32 %v1811_v57, %v2250_v59 }
 0x100   :  { %442 = vperm.xlu1 %1759, %v373_v39   ;;  %437 = vperm.xlu0 %1758, %v372_v41   ;;  %v238_v50 = vadd.f32 1e-13, %v234_v43  ;;  %v227_v14 = vadd.f32 %v226_v2, %v225_v0 }
 0x102   :  { %1816 = vrcp.f32 %v238_v50  ;;  %v237_v25 = vadd.f32 1e-13, %v227_v14 }
 0x103   :  { %v1813_v15 = vpop.eup %1812  ;;  %1818 = vrcp.f32 %v370_v55 }
 0x104   :  { %447 = vperm.xlu1 %1759, %v375_v10   ;;  %v242_v6 = vmul.f32 %v1813_v15, %v2287_v56  ;;  %v1815_v61 = vpop.eup %1814  ;;  %1820 = vrcp.f32 %v235_v12 }
 0x105   :  { %v378_v20 = vmul.f32 %v1815_v61, %v2268_v19  ;;  %v379_v28 = vmul.f32 %v1815_v61, %v2272_v26  ;;  %1822 = vrcp.f32 %v237_v25  ;;  %v1762_v26 = vld [vmem:[%s2676_s4 + $0x10] sm:$0xff]  }
 0x106   :  { %390 = vperm.xlu0 %1758, %v242_v6   ;;  %1689 = vmatprep.subr.bf16.mxu1 %v1762_v26 }
 0x107   :  { %1690 = vmatpush3.bf16.msra.mxu1 %v1762_v26 }
 0x108   :  { %452 = vperm.xlu1 %1759, %v376_v49  }
 0x10c   :  { %v1817_v21 = vpop.eup %1816  ;;  %457 = vperm.xlu1 %1759, %v378_v20  }
 0x10d   :  { %v246_v44 = vmul.f32 %v1817_v21, %v206_v51  ;;  %v1819_v56 = vpop.eup %1818 }
 0x10e   :  { %v381_v59 = vmul.f32 %v1819_v56, %v2279_v58  ;;  %v382_v53 = vmul.f32 %v1819_v56, %v2282_v42  ;;  %v1821_v38 = vpop.eup %1820  ;;  %v1763_v58 = vld [vmem:[%s2676_s4 + $0x18] sm:$0xff]   ;;  %v1764_v42 = vld [vmem:[%s2676_s4 + $0x20] sm:$0xff]  }
 0x10f   :  { %400 = vperm.xlu0 %1758, %v246_v44   ;;  %v240_v19 = vmul.f32 %v1821_v38, %v2294_v16  ;;  %v1823_v40 = vpop.eup %1822  ;;  %v1957_v16 = vmov 0.0   ;;  %1691 = vmatprep.subr.bf16.mxu1 %v1763_v58 }
 0x110   :  { %462 = vperm.xlu1 %1759, %v379_v28   ;;  %v244_v51 = vmul.f32 %v1823_v40, %v2301_v63  ;;  %1681 = vmatprep.subr.bf16.mxu0 %v1957_v16  ;;  %v2330_v63 = vld [vmem:[%s2676_s4] sm:$0xff]  }
 0x111   :  { %1682 = vmatpush3.bf16.msra.mxu0 %v1764_v42  ;;  %1692 = vmatpush3.bf16.msra.mxu1 %v1763_v58 }
 0x112   :  { %1683 = vmatprep.subr.bf16.mxu0 %v1957_v16  ;;  %1685 = vmatprep.mubr.msk.bf16.mxu0 %vm1958_vm14, %v1957_v16 }
 0x113   :  { %1697 = vmatprep.subr.bf16.mxu1 %v2330_v63 }
 0x114   :  { %467 = vperm.xlu1 %1759, %v381_v59  }
 0x115   :  { %1684 = vmatpush3.bf16.msra.mxu0 %v1766_v35 }
 0x116   :  { %1705 = vmatprep.subr.bf16.mxu0 %v1957_v16 }
 0x118   :  { %472 = vperm.xlu1 %1759, %v382_v53  }
 0x11c   :  { %385 = vperm.xlu1 %1759, %v240_v19  }
 0x120   :  { %395 = vperm.xlu1 %1759, %v244_v51  }
 0x17f   :  { %v443_v33 = vpop.permute.xlu1 %442  ;;  %v438_v27 = vpop.permute.xlu0 %437 }
 0x180   :  { %v476_v32 = vmul.f32 %v443_v33, %v2039_v7  ;;  %v475_v34 = vmul.f32 %v438_v27, %v2035_v4 }
 0x182   :  { %v484_v39 = vsel %vm97_vm0, %v476_v32, 0.0  ;;  %v483_v41 = vsel %vm97_vm0, %v475_v34, 0.0 }
 0x183   :  { %v485_v43 = vadd.f32 %v484_v39, %v483_v41  ;;  %v448_v57 = vpop.permute.xlu1 %447 }
 0x184   :  { %v477_v55 = vmul.f32 %v448_v57, %v2033_v3 }
 0x185   :  { %v486_v50 = vrot.slane %v485_v43, 4  ;;  %v391_v15 = vpop.permute.xlu0 %390 }
 0x186   :  { %v492_v11 = vsel %vm97_vm0, %v477_v55, 0.0  ;;  %v404_v14 = vmul.f32 %v391_v15, %v2069_v29 }
 0x187   :  { %v487_v62 = vadd.f32 %v486_v50, %v485_v43  ;;  %v453_v0 = vpop.permute.xlu1 %452 }
 0x188   :  { %v478_v10 = vmul.f32 %v453_v0, %v2037_v5  ;;  %v414_v38 = vsel %vm97_vm0, %v404_v14, 0.0 }
 0x189   :  { %v488_v6 = vrot.slane %v487_v62, 2  ;;  %v415_v33 = vrot.slane %v414_v38, 4 }
 0x18a   :  { %v493_v2 = vsel %vm97_vm0, %v478_v10, 0.0 }
 0x18b   :  { %v494_v49 = vadd.f32 %v493_v2, %v492_v11  ;;  %v458_v61 = vpop.permute.xlu1 %457  ;;  %v489_v20 = vadd.f32 %v488_v6, %v487_v62  ;;  %v416_v55 = vadd.f32 %v415_v33, %v414_v38 }
 0x18c   :  { %v479_v21 = vmul.f32 %v458_v61, %v2046_v13 }
 0x18d   :  { %v495_v12 = vrot.slane %v494_v49, 4  ;;  %v490_v19 = vrot.slane %v489_v20, 1 }
 0x18e   :  { %v401_v44 = vpop.permute.xlu0 %400  ;;  %v501_v40 = vsel %vm97_vm0, %v479_v21, 0.0 }
 0x18f   :  { %v496_v25 = vadd.f32 %v495_v12, %v494_v49  ;;  %v406_v28 = vmul.f32 %v401_v44, %v2081_v36  ;;  %v463_v56 = vpop.permute.xlu1 %462  ;;  %v491_v32 = vadd.f32 %v490_v19, %v489_v20  ;;  %v417_v20 = vrot.slane %v416_v55, 2 }
 0x190   :  { %v480_v59 = vmul.f32 %v463_v56, %v2041_v8 }
 0x191   :  { %v497_v53 = vrot.slane %v496_v25, 2  ;;  %v428_v26 = vsel %vm97_vm0, %v406_v28, 0.0  ;;  %v521_v10 = vmul.f32 %v491_v32, %v2072_v30  ;;  %v418_v38 = vadd.f32 %v417_v20, %v416_v55 }
 0x192   :  { %v502_v51 = vsel %vm97_vm0, %v480_v59, 0.0  ;;  %v429_v39 = vrot.slane %v428_v26, 4 }
 0x193   :  { %v503_v58 = vadd.f32 %v502_v51, %v501_v40  ;;  %v468_v42 = vpop.permute.xlu1 %467  ;;  %v498_v35 = vadd.f32 %v497_v53, %v496_v25 }
 0x194   :  { %v481_v41 = vmul.f32 %v468_v42, %v2053_v18  ;;  %v430_v6 = vadd.f32 %v429_v39, %v428_v26 }
 0x195   :  { %v504_v27 = vrot.slane %v503_v58, 4  ;;  %v499_v34 = vrot.slane %v498_v35, 1 }
 0x196   :  { %v510_v11 = vsel %vm97_vm0, %v481_v41, 0.0  ;;  %v431_v28 = vrot.slane %v430_v6, 2  ;;  %v527_v41 = vpack.c.bf16 %v491_v32, %v491_v32 }
 0x197   :  { %v505_v43 = vadd.f32 %v504_v27, %v503_v58  ;;  %v473_v57 = vpop.permute.xlu1 %472  ;;  %v500_v50 = vadd.f32 %v499_v34, %v498_v35  ;;  %v419_v34 = vrot.slane %v418_v38, 1 }
 0x198   :  { %v482_v62 = vmul.f32 %v473_v57, %v2051_v17  ;;  %v432_v58 = vadd.f32 %v431_v28, %v430_v6 }
 0x199   :  { %v506_v0 = vrot.slane %v505_v43, 2  ;;  %v522_v15 = vmul.f32 %v500_v50, %v2069_v29  ;;  %v528_v42 = vpack.c.bf16 %v500_v50, %v500_v50  ;;  %v420_v6 = vadd.f32 %v419_v34, %v418_v38  ;;  %v1767_v38 = vld [vmem:[%s2678_s6 + $0x20] sm:$0xff]  }
 0x19a   :  { %v511_v2 = vsel %vm97_vm0, %v482_v62, 0.0 }
 0x19b   :  { %v507_v49 = vadd.f32 %v506_v0, %v505_v43  ;;  %v512_v61 = vadd.f32 %v511_v2, %v510_v11  ;;  %v386_v12 = vpop.permute.xlu1 %385  ;;  %v525_v14 = vpack.c.bf16 %v522_v15, %v521_v10  ;;  %v433_v0 = vrot.slane %v432_v58, 1 }
 0x19c   :  { %v403_v21 = vmul.f32 %v386_v12, %v2072_v30  ;;  %v541_v55 = vunpack.c.l.b16 %v528_v42  ;;  %v540_v2 = vunpack.c.l.b16 %v527_v41 }
 0x19d   :  { %v508_v44 = vrot.slane %v507_v49, 1  ;;  %v513_v25 = vrot.slane %v512_v61, 4  ;;  %1693 = vmatprep.mubr.msk.bf16.mxu1 %vm97_vm0, %v525_v14  ;;  %v2368_v20 = vadd.f32 %v433_v0, %v432_v58  ;;  %v1771_v58 = vld [vmem:[%s2678_s6 + $0x10] sm:$0xff]  }
 0x19e   :  { %v407_v56 = vsel %vm97_vm0, %v403_v21, 0.0  ;;  %v545_v21 = vsel %vm544_vm15, %v541_v55, %v540_v2  ;;  %v1864_v0 = vld [vmem:[#allocation5] sm:$0xff]   ;;  %v1865_v55 = vld [vmem:[#allocation5 + $0x8] sm:$0xff]  }
 0x19f   :  { %v514_v29 = vadd.f32 %v513_v25, %v512_v61  ;;  %v408_v59 = vrot.slane %v407_v56, 4  ;;  %v396_v53 = vpop.permute.xlu1 %395  ;;  %v509_v19 = vadd.f32 %v508_v44, %v507_v49 }
 0x1a0   :  { %v405_v40 = vmul.f32 %v396_v53, %v2084_v37 }
 0x1a1   :  { %v515_v51 = vrot.slane %v514_v29, 2  ;;  %v409_v26 = vadd.f32 %v408_v59, %v407_v56  ;;  %v529_v39 = vpack.c.bf16 %v509_v19, %v509_v19  ;;  %v523_v49 = vmul.f32 %v509_v19, %v2084_v37 }
 0x1a2   :  { %v421_v30 = vsel %vm97_vm0, %v405_v40, 0.0  ;;  %v980_v59 = vpack.c.bf16 %v420_v6, %v420_v6  ;;  %v982_v19 = vpack.c.bf16 %v2368_v20, %v2368_v20 }
 0x1a3   :  { %v516_v35 = vadd.f32 %v515_v51, %v514_v29  ;;  %v410_v33 = vrot.slane %v409_v26, 2  ;;  %v422_v27 = vrot.slane %v421_v30, 4  ;;  %v542_v50 = vunpack.c.l.b16 %v529_v39  ;;  %v1768_v29 = vld [vmem:[%s2676_s4 + $0x8] sm:$0xff]  }
 0x1a4   :  { %v993_v42 = vunpack.c.l.b16 %v980_v59  ;;  %v1633_v59 = vld [vmem:[%s2679_s7] ss:$0 sm:$0xff] }
 0x1a5   :  { %v517_v43 = vrot.slane %v516_v35, 1  ;;  %v411_v57 = vadd.f32 %v410_v33, %v409_v26  ;;  %v423_v62 = vadd.f32 %v422_v27, %v421_v30  ;;  %v547_v37 = vsel %vm546_vm12, %v542_v50, %v545_v21  ;;  %v1772_v33 = vld [vmem:[%s2678_s6] sm:$0xff]  }
 0x1a7   :  { %v518_v10 = vadd.f32 %v517_v43, %v516_v35  ;;  %v412_v15 = vrot.slane %v411_v57, 1  ;;  %v424_v11 = vrot.slane %v423_v62, 2  ;;  %v1769_v35 = vld [vmem:[%s2678_s6 + $0x28] sm:$0xff]  }
 0x1a9   :  { %v530_v61 = vpack.c.bf16 %v518_v10, %v518_v10  ;;  %v413_v12 = vadd.f32 %v412_v15, %v411_v57  ;;  %v425_v14 = vadd.f32 %v424_v11, %v423_v62  ;;  %v524_v32 = vmul.f32 %v518_v10, %v2081_v36  ;;  %v1774_v57 = vld [vmem:[%s2678_s6 + $0x8] sm:$0xff]   ;;  %v1866_v11 = vld [vmem:[#allocation5 + $0x10] sm:$0xff]  }
 0x1ab   :  { %v543_v44 = vunpack.c.l.b16 %v530_v61  ;;  %v979_v25 = vpack.c.bf16 %v413_v12, %v413_v12  ;;  %v426_v28 = vrot.slane %v425_v14, 1  ;;  %v526_v56 = vpack.c.bf16 %v524_v32, %v523_v49 }
 0x1ac   :  { %v967_v39 = vmul.f32 %v413_v12, %v2035_v4  ;;  %v968_v41 = vmul.f32 %v413_v12, %v2039_v7  ;;  %v969_v4 = vmul.f32 %v420_v6, %v2033_v3  ;;  %v970_v7 = vmul.f32 %v420_v6, %v2037_v5 }
 0x1ad   :  { %v427_v53 = vadd.f32 %v426_v28, %v425_v14  ;;  %1694 = vmatmul.mubr.msk.bf16.vlgmr.msra.gmra.mrb[0].mxu1 %vm97_vm0, %v526_v56  ;;  %v549_v36 = vsel %vm548_vm13, %v543_v44, %v547_v37  ;;  %v992_v40 = vunpack.c.l.b16 %v979_v25  ;;  %v973_v3 = vmul.f32 %v2368_v20, %v2053_v18  ;;  %v1610_v14 = vld [vmem:[%s2677_s5] ss:$0 sm:$0xff] }
 0x1ae   :  { %1698 = vmatpush3.bf16.msra.mxu1 %v2330_v63  ;;  %v550_v51 = vpack.c.b16 %v549_v36, %v549_v36  ;;  %1701 = vmatprep.mubr.msk.bf16.mxu1 %vm97_vm0, %v2059_v23  ;;  %v995_v63 = vunpack.c.l.b16 %v982_v19  ;;  %v975_v62 = vpack.c.bf16 %v968_v41, %v967_v39  ;;  %v974_v5 = vmul.f32 %v2368_v20, %v2051_v17 }
 0x1af   :  { %v981_v26 = vpack.c.bf16 %v427_v53, %v427_v53  ;;  %1699 = vmatprep.subr.bf16.mxu1 %v1768_v29  ;;  %v996_v23 = vsel %vm544_vm15, %v993_v42, %v992_v40  ;;  %v971_v10 = vmul.f32 %v427_v53, %v2046_v13  ;;  %v972_v15 = vmul.f32 %v427_v53, %v2041_v8  ;;  %v1867_v8 = vld [vmem:[#allocation5 + $0x18] sm:$0xff]  }
 0x1b0   :  { %1686 = vmatmul.mubr.msk.bf16.vlgmr.msra.gmra.mrb[0].mxu0 %vm97_vm0, %v550_v51  ;;  %v978_v13 = vpack.c.bf16 %v974_v5, %v973_v3  ;;  %v1959_v6 = vmov 1966171168   ;;  %v768_v49 = vlaneseq }
 0x1b1   :  { %v994_v30 = vunpack.c.l.b16 %v981_v26  ;;  %1706 = vmatpush3.bf16.msra.mxu0 %v1767_v38  ;;  %1709 = vmatprep.mubr.msk.bf16.mxu0 %vm1958_vm14, %v1957_v16  ;;  %v977_v50 = vpack.c.bf16 %v972_v15, %v971_v10  ;;  %v766_v2 = vunpack.c.l.s4 %v1959_v6 }
 0x1b2   :  { %1700 = vmatpush3.bf16.msra.mxu1 %v1768_v29  ;;  %1707 = vmatprep.subr.bf16.mxu0 %v1957_v16  ;;  %v1773_v16 = vld [vmem:[%s2678_s6 + $0x18] sm:$0xff]   ;;  %v769_v12 = vshrl.u32 %v768_v49, 7 }
 0x1b3   :  { %v997_v27 = vsel %vm546_vm12, %v994_v30, %v996_v23  ;;  %1713 = vmatprep.subr.bf16.mxu1 %v1771_v58  ;;  %v767_v61 = vunpack.c.0.s8 %v766_v2 }
 0x1b4   :  { %v998_v34 = vsel %vm548_vm13, %v995_v63, %v997_v27  ;;  %v791_v29 = vsub.s32 0, %v769_v12 }
 0x1b5   :  { %1708 = vmatpush3.bf16.msra.mxu0 %v1769_v35  ;;  %v999_v43 = vpack.c.b16 %v998_v34, %v998_v34  ;;  %v770_v32 = vsub.s32 %v767_v61, %v769_v12 }
 0x1b6   :  { %1725 = vmatprep.subr.bf16.mxu0 %v1772_v33 }
 0x1b8   :  { %1710 = vmatmul.mubr.msk.bf16.vlgmr.msra.gmra.mrb[4].mxu0 %vm97_vm0, %v999_v43 }
 0x1b9   :  { %1702 = vmatmul.mubr.msk.bf16.vlgmr.msra.gmra.mrb[0].mxu1 %vm97_vm0, %v2074_v31  ;;  %1726 = vmatpush3.bf16.msra.mxu0 %v1772_v33  ;;  %v976_v31 = vpack.c.bf16 %v970_v7, %v969_v4 }
 0x1ba   :  { %1714 = vmatpush3.bf16.msra.mxu1 %v1771_v58  ;;  %1717 = vmatprep.mubr.msk.bf16.mxu1 %vm97_vm0, %v975_v62 }
 0x1bb   :  { %1715 = vmatprep.subr.bf16.mxu1 %v1773_v16  ;;  %1727 = vmatprep.subr.bf16.mxu0 %v1774_v57 }
 0x1bc   :  { %1729 = vmatprep.mubr.msk.bf16.mxu0 %vm97_vm0, %v1864_v0 }
 0x1bd   :  { %1728 = vmatpush3.bf16.msra.mxu0 %v1774_v57 }
 0x1be   :  { %1716 = vmatpush3.bf16.msra.mxu1 %v1773_v16 }
 0x1c0   :  { %1730 = vmatmul.mubr.msk.bf16.vlgmr.msra.gmra.mrb[8].mxu0 %vm97_vm0, %v1865_v55 }
 0x1c1   :  { %1718 = vmatmul.mubr.msk.bf16.vlgmr.msra.gmra.mrb[4].mxu1 %vm97_vm0, %v976_v31  ;;  %1733 = vmatprep.mubr.msk.bf16.mxu0 %vm97_vm0, %v1866_v11 }
 0x1c2   :  { %1721 = vmatprep.mubr.msk.bf16.mxu1 %vm97_vm0, %v977_v50 }
 0x1c8   :  { %1734 = vmatmul.mubr.msk.bf16.gmra.mrb[12].mxu0 %vm97_vm0, %v1867_v8 }
 0x1c9   :  { %1722 = vmatmul.mubr.msk.bf16.gmra.mrb[8].mxu1 %vm97_vm0, %v978_v13  ;;  %v1654_v13 = vld [vmem:[%s2679_s7 + $0x1] ss:$0 sm:$0xff]  ;;  %vm2685_vm0 = vcmp.gt.f32.partialorder %v2212_v60, 0.0 }
 0x283   :  { %v600_v18 = vpop.f32.mrb[0].mxu0 }
 0x284   :  { %v610_v21 = vsub.f32 %v1610_v14, %v600_v18  ;;  %v1687_v44 = vpop.f32.mrb[1].mxu0 }
 0x285   :  { %v603_v17 = vpop.f32.mrb[2].mxu0 }
 0x286   :  { %v771_v20 = vrot.slane %v610_v21, %v770_v32  ;;  %v1688_v25 = vpop.f32.mrb[3].mxu0 }
 0x288   :  { %v772_v28 = vcombine.high %v771_v20, %v771_v20  ;;  %v779_v56 = vrot.slane %v771_v20, %v770_v32 }
 0x28a   :  { %v787_v37 = vcombine.high %v779_v56, %v779_v56  ;;  %v786_v53 = vrot.slane %v772_v28, %v770_v32  ;;  %v792_v26 = vrot.slane %v779_v56, %v791_v29 }
 0x28b   :  { %v1049_v36 = vpop.f32.mrb[4].mxu0 }
 0x28c   :  { %v1059_v38 = vsub.f32 %v1633_v59, %v1049_v36  ;;  %v1703_v19 = vpop.f32.mrb[0].mxu1  ;;  %v800_v40 = vrot.slane %v787_v37, %v791_v29  ;;  %v1711_v51 = vpop.f32.mrb[5].mxu0  ;;  %v788_v58 = vcombine.high %v786_v53, %v786_v53  ;;  %v796_v35 = vrot.slane %v786_v53, %v791_v29 }
 0x28d   :  { %v749_v42 = vpop.f32.mrb[1].mxu1  ;;  %v1052_v30 = vpop.f32.mrb[6].mxu0 }
 0x28e   :  { %v1274_v63 = vrot.slane %v1059_v38, %v770_v32  ;;  %v2434_v23 = vadd.f32 %v1703_v19, %v800_v40  ;;  %v2436_v33 = vadd.f32 %v792_v26, %v749_v42  ;;  %v1704_v27 = vpop.f32.mrb[2].mxu1  ;;  %v804_v34 = vrot.slane %v788_v58, %v791_v29  ;;  %v1712_v39 = vpop.f32.mrb[7].mxu0 }
 0x28f   :  { %v752_v41 = vpop.f32.mrb[3].mxu1 }
 0x290   :  { %v1275_v43 = vcombine.high %v1274_v63, %v1274_v63  ;;  %v2438_v16 = vadd.f32 %v1704_v27, %v804_v34  ;;  %v2440_v57 = vadd.f32 %v796_v35, %v752_v41  ;;  %v1282_v62 = vrot.slane %v1274_v63, %v770_v32 }
 0x292   :  { %v1289_v0 = vrot.slane %v1275_v43, %v770_v32  ;;  %v1295_v3 = vrot.slane %v1282_v62, %v791_v29  ;;  %v1290_v17 = vcombine.high %v1282_v62, %v1282_v62  ;;  %v1625_v62 = vld [vmem:[%s2677_s5 + $0x1] ss:$0 sm:$0xff] }
 0x293   :  { %v1731_v4 = vpop.f32.mrb[8].mxu0 }
 0x294   :  { %v1719_v7 = vpop.f32.mrb[4].mxu1  ;;  %v1299_v55 = vrot.slane %v1289_v0, %v791_v29  ;;  %v1236_v10 = vpop.f32.mrb[9].mxu0  ;;  %v1291_v18 = vcombine.high %v1289_v0, %v1289_v0  ;;  %v1303_v19 = vrot.slane %v1290_v17, %v791_v29  ;;  %v818_v0 = vmul.f32 %v1625_v62, %v2440_v57 }
 0x295   :  { %v1245_v15 = vadd.f32 %v1731_v4, %v1719_v7  ;;  %v1127_v11 = vpop.f32.mrb[5].mxu1  ;;  %v1732_v31 = vpop.f32.mrb[10].mxu0  ;;  %v817_v4 = vmul.f32 %v1625_v62, %v2436_v33  ;;  %v819_v7 = vmul.f32 %v1625_v62, %v2434_v23 }
 0x296   :  { %v1237_v50 = vadd.f32 %v1236_v10, %v1127_v11  ;;  %v1720_v5 = vpop.f32.mrb[6].mxu1  ;;  %v1239_v8 = vpop.f32.mrb[11].mxu0  ;;  %v1307_v37 = vrot.slane %v1291_v18, %v791_v29 }
 0x297   :  { %v2445_v6 = vadd.f32 %v1299_v55, %v1245_v15  ;;  %v1248_v2 = vadd.f32 %v1732_v31, %v1720_v5  ;;  %v1130_v49 = vpop.f32.mrb[7].mxu1 }
 0x298   :  { %v2447_v61 = vadd.f32 %v1295_v3, %v1237_v50  ;;  %v1240_v12 = vadd.f32 %v1239_v8, %v1130_v49 }
 0x299   :  { %v2449_v14 = vadd.f32 %v1299_v55, %v1248_v2  ;;  %v1326_v32 = vmul.f32 %v1654_v13, %v2445_v6  ;;  %v820_v55 = vmul.f32 %v1625_v62, %v2438_v16 }
 0x29a   :  { %v2452_v21 = vadd.f32 %v1295_v3, %v1240_v12  ;;  %v1324_v44 = vmul.f32 %v1654_v13, %v2447_v61 }
 0x29b   :  { %1336 = vadd.xlane.f32.xlu1 %v1326_v32  ;;  %v1735_v20 = vpop.f32.mrb[12].mxu0  ;;  %v1327_v26 = vmul.f32 %v1654_v13, %v2449_v14 }
 0x29c   :  { %v1252_v25 = vpop.f32.mrb[13].mxu0  ;;  %1332 = vadd.xlane.f32.xlu0 %v1324_v44  ;;  %v1723_v28 = vpop.f32.mrb[8].mxu1  ;;  %v1325_v56 = vmul.f32 %v1654_v13, %v2452_v21 }
 0x29d   :  { %v1261_v59 = vadd.f32 %v1735_v20, %v1723_v28  ;;  %v1143_v53 = vpop.f32.mrb[9].mxu1  ;;  %v1736_v36 = vpop.f32.mrb[14].mxu0 }
 0x29e   :  { %v1253_v38 = vadd.f32 %v1252_v25, %v1143_v53  ;;  %v1724_v40 = vpop.f32.mrb[10].mxu1  ;;  %v1255_v51 = vpop.f32.mrb[15].mxu0 }
 0x29f   :  { %v2457_v58 = vadd.f32 %v1307_v37, %v1261_v59  ;;  %v1264_v42 = vadd.f32 %v1736_v36, %v1724_v40  ;;  %1334 = vadd.xlane.f32.xlu1 %v1325_v56  ;;  %v1146_v30 = vpop.f32.mrb[11].mxu1 }
 0x2a0   :  { %v2459_v35 = vadd.f32 %v1303_v19, %v1253_v38  ;;  %v1256_v63 = vadd.f32 %v1255_v51, %v1146_v30  ;;  %1338 = vadd.xlane.f32.xlu0 %v1327_v26 }
 0x2a1   :  { %v2461_v27 = vadd.f32 %v1307_v37, %v1264_v42  ;;  %v1330_v34 = vmul.f32 %v1654_v13, %v2457_v58 }
 0x2a2   :  { %v2464_v39 = vadd.f32 %v1303_v19, %v1256_v63  ;;  %v1328_v41 = vmul.f32 %v1654_v13, %v2459_v35 }
 0x2a3   :  { %v1331_v29 = vmul.f32 %v1654_v13, %v2461_v27 }
 0x2a4   :  { %1344 = vadd.xlane.f32.xlu0 %v1330_v34  ;;  %v1329_v43 = vmul.f32 %v1654_v13, %v2464_v39 }
 0x2a5   :  { %1346 = vadd.xlane.f32.xlu1 %v1331_v29 }
 0x2a8   :  { %1340 = vadd.xlane.f32.xlu0 %v1328_v41 }
 0x2a9   :  { %1342 = vadd.xlane.f32.xlu1 %v1329_v43 }
 0x2ac   :  { %823 = vadd.xlane.f32.xlu0 %v818_v0 }
 0x2ad   :  { %821 = vadd.xlane.f32.xlu1 %v817_v4 }
 0x2b0   :  { %825 = vadd.xlane.f32.xlu0 %v819_v7 }
 0x2b1   :  { %827 = vadd.xlane.f32.xlu1 %v820_v55 }
 0x328   :  { %v1337_v10 = vpop.xlane.xlu1 %1336 }
 0x329   :  { %v1333_v15 = vpop.xlane.xlu0 %1332  ;;  %v1350_v31 = vsel %vm249_vm1, %v1337_v10, -1e+30 }
 0x32a   :  { %v1348_v11 = vsel %vm247_vm2, %v1333_v15, -1e+30  ;;  %v1365_v49 = vsel %vm162_vm5, %v1350_v31, -inf  ;;  %vm1558_vm2 = vcmask 1045509  }
 0x32b   :  { %v1356_v8 = vsel %vm162_vm5, %v1348_v11, -inf }
 0x32c   :  { %v1335_v50 = vpop.xlane.xlu1 %1334 }
 0x32d   :  { %v1349_v3 = vsel %vm248_vm4, %v1335_v50, -1e+30  ;;  %v1339_v5 = vpop.xlane.xlu0 %1338  ;;  %vm1566_vm4 = vcmask 1047559  }
 0x32e   :  { %v1357_v13 = vsel %vm162_vm5, %v1349_v3, -inf  ;;  %v1351_v2 = vsel %vm250_vm3, %v1339_v5, -1e+30  ;;  %vm1562_vm3 = vcmask 1046534  }
 0x32f   :  { %v1358_v12 = vmax.f32 %v1356_v8, %v1357_v13  ;;  %v1366_v46 = vsel %vm162_vm5, %v1351_v2, -inf }
 0x330   :  { %v1367_v32 = vmax.f32 %v1365_v49, %v1366_v46 }
 0x331   :  { %v1359_v45 = vrot.slane %v1358_v12, 4  ;;  %v1345_v18 = vpop.xlane.xlu0 %1344 }
 0x332   :  { %v1368_v44 = vrot.slane %v1367_v32, 4  ;;  %v2490_v48 = vsel %vm253_vm9, %v1345_v18, -1e+30  ;;  %v1347_v17 = vpop.xlane.xlu1 %1346 }
 0x333   :  { %v1360_v20 = vmax.f32 %v1358_v12, %v1359_v45  ;;  %v1383_v25 = vsel %vm162_vm5, %v2490_v48, -inf  ;;  %v2496_v47 = vsel %vm254_vm8, %v1347_v17, -1e+30 }
 0x334   :  { %v1369_v28 = vmax.f32 %v1367_v32, %v1368_v44  ;;  %v1384_v56 = vsel %vm162_vm5, %v2496_v47, -inf }
 0x335   :  { %v1361_v59 = vrot.slane %v1360_v20, 2  ;;  %v1385_v37 = vmax.f32 %v1383_v25, %v1384_v56  ;;  %v1341_v53 = vpop.xlane.xlu0 %1340 }
 0x336   :  { %v1370_v36 = vrot.slane %v1369_v28, 2  ;;  %v2502_v9 = vsel %vm251_vm7, %v1341_v53, -1e+30  ;;  %v1343_v38 = vpop.xlane.xlu1 %1342 }
 0x337   :  { %v1362_v19 = vmax.f32 %v1360_v20, %v1361_v59  ;;  %v1386_v40 = vrot.slane %v1385_v37, 4  ;;  %v1374_v1 = vsel %vm162_vm5, %v2502_v9, -inf  ;;  %v2508_v51 = vsel %vm252_vm6, %v1343_v38, -1e+30 }
 0x338   :  { %v1371_v26 = vmax.f32 %v1369_v28, %v1370_v36  ;;  %v1375_v42 = vsel %vm162_vm5, %v2508_v51, -inf }
 0x339   :  { %v1363_v30 = vrot.slane %v1362_v19, 1  ;;  %v1387_v63 = vmax.f32 %v1385_v37, %v1386_v40  ;;  %v1376_v34 = vmax.f32 %v1374_v1, %v1375_v42  ;;  %v824_v54 = vpop.xlane.xlu0 %823  ;;  %v2686_v42 = vld [vmem:[#allocation11_spill] sm:$0xff] }
 0x33a   :  { %v1372_v29 = vrot.slane %v1371_v26, 1  ;;  %v830_v41 = vsel %vm155_vm10, %v824_v54, -1e+30  ;;  %v822_v43 = vpop.xlane.xlu1 %821  ;;  %vm2687_vm1 = vcmp.gt.f32.partialorder %v2686_v42, 0.0 }
 0x33b   :  { %v1364_v62 = vmax.f32 %v1362_v19, %v1363_v30  ;;  %v1388_v0 = vrot.slane %v1387_v63, 2  ;;  %v1377_v4 = vrot.slane %v1376_v34, 4  ;;  %v840_v52 = vsel %vm162_vm5, %v830_v41, -inf }
 0x33c   :  { %v1373_v7 = vmax.f32 %v1371_v26, %v1372_v29  ;;  %v841_v55 = vrot.slane %v840_v52, 4  ;;  %v2517_v10 = vsel %vm154_vm11, %v822_v43, -1e+30 }
 0x33d   :  { %v1392_v15 = vsub.f32 %v1348_v11, %v1364_v62  ;;  %v1393_v50 = vsub.f32 %v1349_v3, %v1364_v62  ;;  %v1389_v5 = vmax.f32 %v1387_v63, %v1388_v0  ;;  %v1378_v8 = vmax.f32 %v1376_v34, %v1377_v4  ;;  %v826_v46 = vpop.xlane.xlu0 %825 }
 0x33e   :  { %v1394_v13 = vsub.f32 %v1350_v31, %v1373_v7  ;;  %v1395_v49 = vsub.f32 %v1351_v2, %v1373_v7  ;;  %v842_v22 = vmax.f32 %v840_v52, %v841_v55  ;;  %v833_v12 = vsel %vm162_vm5, %v2517_v10, -inf  ;;  %v828_v59 = vpop.xlane.xlu1 %827 }
 0x33f   :  { %v1400_v32 = vmul.f32 1.442695, %v1392_v15  ;;  %v1402_v45 = vmul.f32 1.442695, %v1393_v50  ;;  %v1390_v18 = vrot.slane %v1389_v5, 1  ;;  %v1379_v44 = vrot.slane %v1378_v8, 2 }
 0x340   :  { %v1404_v17 = vmul.f32 1.442695, %v1394_v13  ;;  %v1406_v20 = vmul.f32 1.442695, %v1395_v49  ;;  %v843_v24 = vrot.slane %v842_v22, 2  ;;  %v834_v25 = vrot.slane %v833_v12, 4 }
 0x341   :  { %1824 = vpow2.f32 %v1400_v32  ;;  %v1391_v11 = vmax.f32 %v1389_v5, %v1390_v18  ;;  %v1380_v3 = vmax.f32 %v1378_v8, %v1379_v44  ;;  %v2523_v31 = vsel %vm2685_vm0, %v826_v46, -1e+30  ;;  %v1869_v32 = vld [vmem:[%s2674_s2 + $0x10] sm:$0xff] }
 0x342   :  { %1826 = vpow2.f32 %v1402_v45  ;;  %v844_v2 = vmax.f32 %v842_v22, %v843_v24  ;;  %v835_v28 = vmax.f32 %v833_v12, %v834_v25  ;;  %v847_v56 = vsel %vm162_vm5, %v2523_v31, -inf }
 0x343   :  { %1828 = vpow2.f32 %v1404_v17  ;;  %v1398_v37 = vsub.f32 %v2490_v48, %v1391_v11  ;;  %v1399_v53 = vsub.f32 %v2496_v47, %v1391_v11  ;;  %v1381_v36 = vrot.slane %v1380_v3, 1  ;;  %v1871_v11 = vld [vmem:[%s2674_s2 + $0x28] sm:$0xff] }
 0x344   :  { %1830 = vpow2.f32 %v1406_v20  ;;  %v845_v38 = vrot.slane %v844_v2, 1  ;;  %v836_v19 = vrot.slane %v835_v28, 2  ;;  %v848_v40 = vrot.slane %v847_v56, 4 }
 0x345   :  { %v1412_v60 = vmul.f32 1.442695, %v1398_v37  ;;  %v1414_v1 = vmul.f32 1.442695, %v1399_v53  ;;  %v1382_v26 = vmax.f32 %v1380_v3, %v1381_v36  ;;  %v2531_v30 = vsel %vm2687_vm1, %v828_v59, -1e+30 }
 0x346   :  { %v846_v63 = vmax.f32 %v844_v2, %v845_v38  ;;  %v837_v34 = vmax.f32 %v835_v28, %v836_v19  ;;  %v849_v54 = vmax.f32 %v847_v56, %v848_v40  ;;  %v854_v48 = vsel %vm162_vm5, %v2531_v30, -inf }
 0x347   :  { %1832 = vpow2.f32 %v1412_v60  ;;  %v1396_v47 = vsub.f32 %v2502_v9, %v1382_v26  ;;  %v1397_v29 = vsub.f32 %v2508_v51, %v1382_v26  ;;  %v855_v43 = vrot.slane %v854_v48, 4  ;;  %v1868_v51 = vld [vmem:[%s2674_s2 + $0x8] sm:$0xff]  ;;  %v1872_v60 = vld [vmem:[%s2674_s2 + $0x50] sm:$0xff]  ;;  %v1873_v26 = vld [vmem:[%s2674_s2 + $0x58] sm:$0xff] }
 0x348   :  { %1834 = vpow2.f32 %v1414_v1  ;;  %v862_v62 = vsub.f32 %v830_v41, %v846_v63  ;;  %v838_v0 = vrot.slane %v837_v34, 1  ;;  %v850_v4 = vrot.slane %v849_v54, 2 }
 0x349   :  { %v1408_v52 = vmul.f32 1.442695, %v1396_v47  ;;  %v1410_v7 = vmul.f32 1.442695, %v1397_v29  ;;  %v856_v55 = vmax.f32 %v854_v48, %v855_v43 }
 0x34a   :  { %v867_v15 = vmul.f32 1.442695, %v862_v62  ;;  %v839_v50 = vmax.f32 %v837_v34, %v838_v0  ;;  %v851_v5 = vmax.f32 %v849_v54, %v850_v4 }
 0x34b   :  { %v1825_v8 = vpop.eup %1824  ;;  %1836 = vpow2.f32 %v1408_v52  ;;  %v857_v13 = vrot.slane %v856_v55, 2  ;;  %v1875_v52 = vld [vmem:[%s2674_s2 + $0x40] sm:$0xff] }
 0x34c   :  { %v1827_v49 = vpop.eup %1826  ;;  %1838 = vpow2.f32 %v1410_v7  ;;  %v861_v9 = vsub.f32 %v2517_v10, %v839_v50  ;;  %v852_v22 = vrot.slane %v851_v5, 1  ;;  %v2541_v41 = vmul.f32 %v1868_v51, %v1825_v8  ;;  %v1870_v10 = vld [vmem:[%s2674_s2 + $0x20] sm:$0xff] }
 0x34d   :  { %v1829_v12 = vpop.eup %1828  ;;  %1840 = vpow2.f32 %v867_v15  ;;  %v858_v46 = vmax.f32 %v856_v55, %v857_v13  ;;  %v2546_v45 = vmul.f32 %v1869_v32, %v1827_v49  ;;  %v1876_v55 = vld [vmem:[%s2674_s2 + $0x18] sm:$0xff]  ;;  %v1877_v51 = vld [vmem:[%s2674_s2] sm:$0xff] }
 0x34e   :  { %v1831_v18 = vpop.eup %1830  ;;  %v865_v44 = vmul.f32 1.442695, %v861_v9  ;;  %v853_v17 = vmax.f32 %v851_v5, %v852_v22  ;;  %v2551_v20 = vmul.f32 %v1870_v10, %v1829_v12  ;;  %v1424_v24 = vsel %vm162_vm5, %v2541_v41, 0.0 }
 0x34f   :  { %v859_v25 = vrot.slane %v858_v46, 1  ;;  %v2558_v3 = vmul.f32 %v1871_v11, %v1831_v18  ;;  %v1425_v2 = vsel %vm162_vm5, %v2546_v45, 0.0 }
 0x350   :  { %1842 = vpow2.f32 %v865_v44  ;;  %v863_v28 = vsub.f32 %v2523_v31, %v853_v17  ;;  %v1433_v56 = vsel %vm162_vm5, %v2551_v20, 0.0  ;;  %v1426_v59 = vadd.f32 %v1425_v2, %v1424_v24 }
 0x351   :  { %v1833_v37 = vpop.eup %1832  ;;  %v860_v53 = vmax.f32 %v858_v46, %v859_v25  ;;  %v1434_v36 = vsel %vm162_vm5, %v2558_v3, 0.0 }
 0x352   :  { %v1835_v38 = vpop.eup %1834  ;;  %v869_v19 = vmul.f32 1.442695, %v863_v28  ;;  %v1435_v40 = vadd.f32 %v1434_v36, %v1433_v56  ;;  %v2570_v1 = vmul.f32 %v1872_v60, %v1833_v37  ;;  %v1427_v34 = vrot.slane %v1426_v59, 4  ;;  %v1878_v28 = vld [vmem:[%s2674_s2 + $0x30] sm:$0xff] }
 0x353   :  { %v864_v31 = vsub.f32 %v2531_v30, %v860_v53  ;;  %v2576_v42 = vmul.f32 %v1873_v26, %v1835_v38  ;;  %v1874_v30 = vld [vmem:[%s2674_s2 + $0x38] sm:$0xff] }
 0x354   :  { %1844 = vpow2.f32 %v869_v19  ;;  %v1436_v63 = vrot.slane %v1435_v40, 4  ;;  %v1451_v54 = vsel %vm162_vm5, %v2570_v1, 0.0  ;;  %v1428_v5 = vadd.f32 %v1427_v34, %v1426_v59 }
 0x355   :  { %v1837_v48 = vpop.eup %1836  ;;  %v871_v47 = vmul.f32 1.442695, %v864_v31  ;;  %v1452_v29 = vsel %vm162_vm5, %v2576_v42, 0.0 }
 0x356   :  { %v1839_v43 = vpop.eup %1838  ;;  %v1453_v62 = vadd.f32 %v1452_v29, %v1451_v54  ;;  %v2585_v0 = vmul.f32 %v1874_v30, %v1837_v48  ;;  %v1437_v50 = vadd.f32 %v1436_v63, %v1435_v40  ;;  %v1429_v44 = vrot.slane %v1428_v5, 2  ;;  %v1879_v54 = vld [vmem:[%s2674_s2 + $0x48] sm:$0xff]  ;;  %s1960_s2 = smov [#allocation7]  }
 0x357   :  { %v1841_v4 = vpop.eup %1840  ;;  %1846 = vpow2.f32 %v871_v47  ;;  %v2590_v7 = vmul.f32 %v1875_v52, %v1839_v43  ;;  %s1591_s10 = sshll.u32 %s1960_s2, 4  ;;  %s1592_s10 = int_to_ptr.vmem [resolvable:$true] %s1591_s10 }
 0x358   :  { %v2595_v15 = vmul.f32 %v1876_v55, %v1841_v4  ;;  %v1454_v8 = vrot.slane %v1453_v62, 4  ;;  %v1442_v13 = vsel %vm162_vm5, %v2585_v0, 0.0  ;;  %v1438_v18 = vrot.slane %v1437_v50, 2  ;;  %s1924_s3 = scalar_lea.vmem %s1592_s10, 128  ;;  %p1929_p3 = scmp.lt.s32.totalorder %s1592_s10, %s1592_s10 }
 0x359   :  { %v1443_v49 = vsel %vm162_vm5, %v2590_v7, 0.0  ;;  %v1430_v36 = vadd.f32 %v1429_v44, %v1428_v5  ;;  %p1925_p2 = scmp.ne.s32.totalorder %s1592_s10, %s1924_s3  ;;  %p1930_p4 = scmp.lt.s32.totalorder %s1924_s3, %s1924_s3 }
 0x35a   :  { %v1843_v9 = vpop.eup %1842  ;;  %v884_v22 = vsel %vm162_vm5, %v2595_v15, 0.0  ;;  %v1444_v32 = vadd.f32 %v1443_v49, %v1442_v13  ;;  %v1455_v24 = vadd.f32 %v1454_v8, %v1453_v62  ;;  %v1439_v53 = vadd.f32 %v1438_v18, %v1437_v50 }
 0x35b   :  { %v2606_v12 = vmul.f32 %v1877_v51, %v1843_v9  ;;  %v885_v46 = vrot.slane %v884_v22, 4  ;;  %v1431_v43 = vrot.slane %v1430_v36, 1  ;;  %p1931_p5 = por %p1930_p4, %p1929_p3 }
 0x35c   :  { %v1445_v25 = vrot.slane %v1444_v32, 4  ;;  %v1456_v60 = vrot.slane %v1455_v24, 2  ;;  %v1440_v62 = vrot.slane %v1439_v53, 1 }
 0x35d   :  { %v877_v17 = vsel %vm162_vm5, %v2606_v12, 0.0  ;;  %v886_v10 = vadd.f32 %v885_v46, %v884_v22  ;;  %v1432_v51 = vadd.f32 %v1431_v43, %v1430_v36  ;;  %p1932_p6 = pnand %p1931_p5, %p1925_p2 }
 0x35e   :  { %v1845_v11 = vpop.eup %1844  ;;  %v878_v2 = vrot.slane %v877_v17, 4  ;;  %v1446_v31 = vadd.f32 %v1445_v25, %v1444_v32  ;;  %v1457_v30 = vadd.f32 %v1456_v60, %v1455_v24  ;;  %v1441_v22 = vadd.f32 %v1440_v62, %v1439_v53 }
 0x35f   :  { %v2613_v56 = vmul.f32 %v1878_v28, %v1845_v11  ;;  %v887_v59 = vrot.slane %v886_v10, 2  ;;  %v1460_v11 = vadd.f32 1e-13, %v1432_v51 }
 0x360   :  { %v879_v37 = vadd.f32 %v878_v2, %v877_v17  ;;  %v1447_v4 = vrot.slane %v1446_v31, 2  ;;  %v1458_v46 = vrot.slane %v1457_v30, 1  ;;  %v1461_v25 = vadd.f32 1e-13, %v1441_v22 }
 0x361   :  { %v1847_v38 = vpop.eup %1846  ;;  %v891_v19 = vsel %vm162_vm5, %v2613_v56, 0.0  ;;  %v888_v40 = vadd.f32 %v887_v59, %v886_v10 }
 0x362   :  { %v880_v26 = vrot.slane %v879_v37, 2  ;;  %v892_v63 = vrot.slane %v891_v19, 4  ;;  %v2620_v48 = vmul.f32 %v1879_v54, %v1847_v38  ;;  %v1448_v32 = vadd.f32 %v1447_v4, %v1446_v31 }
 0x363   :  { %v889_v34 = vrot.slane %v888_v40, 1  ;;  %v1459_v2 = vadd.f32 %v1458_v46, %v1457_v30 }
 0x364   :  { %v881_v47 = vadd.f32 %v880_v26, %v879_v37  ;;  %v893_v29 = vadd.f32 %v892_v63, %v891_v19  ;;  %v898_v52 = vsel %vm162_vm5, %v2620_v48, 0.0  ;;  %v1449_v59 = vrot.slane %v1448_v32, 1 }
 0x365   :  { %v890_v5 = vadd.f32 %v889_v34, %v888_v40  ;;  %v899_v8 = vrot.slane %v898_v52, 4  ;;  %v1463_v53 = vadd.f32 1e-13, %v1459_v2 }
 0x366   :  { %v882_v55 = vrot.slane %v881_v47, 1  ;;  %v894_v50 = vrot.slane %v893_v29, 2  ;;  %v1450_v36 = vadd.f32 %v1449_v59, %v1448_v32 }
 0x367   :  { %v900_v9 = vadd.f32 %v899_v8, %v898_v52  ;;  %v906_v17 = vadd.f32 1e-13, %v890_v5 }
 0x368   :  { %v883_v13 = vadd.f32 %v882_v55, %v881_v47  ;;  %v895_v49 = vadd.f32 %v894_v50, %v893_v29  ;;  %v1462_v40 = vadd.f32 1e-13, %v1450_v36 }
 0x369   :  { %v901_v10 = vrot.slane %v900_v9, 2 }
 0x36a   :  { %v905_v18 = vadd.f32 1e-13, %v883_v13  ;;  %v896_v44 = vrot.slane %v895_v49, 1 }
 0x36b   :  { %v902_v37 = vadd.f32 %v901_v10, %v900_v9 }
 0x36c   :  { %1848 = vrcp.f32 %v905_v18  ;;  %v897_v24 = vadd.f32 %v896_v44, %v895_v49 }
 0x36d   :  { %1850 = vrcp.f32 %v906_v17  ;;  %v903_v38 = vrot.slane %v902_v37, 1 }
 0x36e   :  { %v907_v28 = vadd.f32 1e-13, %v897_v24 }
 0x36f   :  { %v904_v60 = vadd.f32 %v903_v38, %v902_v37 }
 0x370   :  { %1852 = vrcp.f32 %v907_v28 }
 0x371   :  { %1854 = vrcp.f32 %v1460_v11  ;;  %v908_v34 = vadd.f32 1e-13, %v904_v60 }
 0x372   :  { %1856 = vrcp.f32 %v1461_v25 }
 0x373   :  { %1858 = vrcp.f32 %v1463_v53 }
 0x374   :  { %1860 = vrcp.f32 %v1462_v40 }
 0x375   :  { %1862 = vrcp.f32 %v908_v34 }
 0x376   :  { %v1849_v19 = vpop.eup %1848 }
 0x377   :  { %v910_v31 = vmul.f32 %v1849_v19, %v2606_v12  ;;  %v1851_v26 = vpop.eup %1850 }
 0x378   :  { %v912_v29 = vmul.f32 %v1851_v26, %v2595_v15 }
 0x379   :  { %919 = vperm.xlu0 %1758, %v910_v31  }
 0x37a   :  { %v1853_v63 = vpop.eup %1852 }
 0x37b   :  { %v1855_v54 = vpop.eup %1854  ;;  %v914_v47 = vmul.f32 %v1853_v63, %v2613_v56 }
 0x37c   :  { %v1857_v43 = vpop.eup %1856  ;;  %v1466_v30 = vmul.f32 %v1855_v54, %v2546_v45  ;;  %v1465_v15 = vmul.f32 %v1855_v54, %v2541_v41 }
 0x37d   :  { %929 = vperm.xlu1 %1759, %v914_v47   ;;  %924 = vperm.xlu0 %1758, %v912_v29   ;;  %v1468_v62 = vmul.f32 %v1857_v43, %v2551_v20  ;;  %v1859_v4 = vpop.eup %1858  ;;  %v1469_v12 = vmul.f32 %v1857_v43, %v2558_v3 }
 0x37e   :  { %v1474_v52 = vmul.f32 %v1859_v4, %v2570_v1  ;;  %v1861_v55 = vpop.eup %1860  ;;  %v1475_v3 = vmul.f32 %v1859_v4, %v2576_v42 }
 0x37f   :  { %v1472_v56 = vmul.f32 %v1861_v55, %v2590_v7  ;;  %v1863_v50 = vpop.eup %1862  ;;  %v1471_v20 = vmul.f32 %v1861_v55, %v2585_v0 }
 0x380   :  { %v916_v45 = vmul.f32 %v1863_v50, %v2620_v48 }
 0x381   :  { %1488 = vperm.xlu1 %1759, %v1468_v62   ;;  %1483 = vperm.xlu0 %1758, %v1466_v30  }
 0x385   :  { %1493 = vperm.xlu1 %1759, %v1469_v12   ;;  %1508 = vperm.xlu0 %1758, %v1474_v52  }
 0x389   :  { %1478 = vperm.xlu1 %1759, %v1465_v15   ;;  %1503 = vperm.xlu0 %1758, %v1472_v56  }
 0x38d   :  { %1498 = vperm.xlu1 %1759, %v1471_v20   ;;  %934 = vperm.xlu0 %1758, %v916_v45  }
 0x391   :  { %1513 = vperm.xlu1 %1759, %v1475_v3  }
 0x3f8   :  { %v920_v1 = vpop.permute.xlu0 %919 }
 0x3f9   :  { %v937_v5 = vmul.f32 %v920_v1, %v2436_v33 }
 0x3fb   :  { %v941_v49 = vrot.slane %v937_v5, 4 }
 0x3fc   :  { %v930_v8 = vpop.permute.xlu1 %929  ;;  %v925_v13 = vpop.permute.xlu0 %924 }
 0x3fd   :  { %v939_v41 = vmul.f32 %v930_v8, %v2434_v23  ;;  %v938_v7 = vmul.f32 %v925_v13, %v2440_v57  ;;  %v942_v46 = vadd.f32 %v941_v49, %v937_v5 }
 0x3ff   :  { %v947_v9 = vrot.slane %v938_v7, 4  ;;  %v953_v22 = vrot.slane %v939_v41, 4  ;;  %v943_v24 = vrot.slane %v942_v46, 2 }
 0x400   :  { %v1489_v0 = vpop.permute.xlu1 %1488  ;;  %v1484_v51 = vpop.permute.xlu0 %1483 }
 0x401   :  { %v948_v48 = vadd.f32 %v947_v9, %v938_v7  ;;  %v954_v18 = vadd.f32 %v953_v22, %v939_v41  ;;  %v1518_v33 = vmul.f32 %v1489_v0, %v2445_v6  ;;  %v1517_v28 = vmul.f32 %v1484_v51, %v2452_v21 }
 0x402   :  { %v944_v53 = vadd.f32 %v943_v24, %v942_v46 }
 0x403   :  { %v949_v32 = vrot.slane %v948_v48, 2  ;;  %v955_v25 = vrot.slane %v954_v18, 2 }
 0x404   :  { %v1494_v42 = vpop.permute.xlu1 %1493  ;;  %v1509_v44 = vpop.permute.xlu0 %1508  ;;  %v945_v34 = vrot.slane %v944_v53, 1 }
 0x405   :  { %v950_v17 = vadd.f32 %v949_v32, %v948_v48  ;;  %v1519_v10 = vmul.f32 %v1494_v42, %v2449_v14  ;;  %v956_v19 = vadd.f32 %v955_v25, %v954_v18  ;;  %v1522_v62 = vmul.f32 %v1509_v44, %v2457_v58 }
 0x407   :  { %v1531_v23 = vadd.f32 %v1519_v10, %v1518_v33  ;;  %v951_v57 = vrot.slane %v950_v17, 1 }
 0x408   :  { %v1479_v11 = vpop.permute.xlu1 %1478  ;;  %v1504_v2 = vpop.permute.xlu0 %1503 }
 0x409   :  { %v1532_v59 = vrot.slane %v1531_v23, 4  ;;  %v1516_v37 = vmul.f32 %v1479_v11, %v2447_v61  ;;  %v952_v40 = vadd.f32 %v951_v57, %v950_v17  ;;  %v1521_v26 = vmul.f32 %v1504_v2, %v2464_v39 }
 0x40a   :  { %v957_v61 = vrot.slane %v956_v19, 1  ;;  %v946_v39 = vadd.f32 %v945_v34, %v944_v53 }
 0x40b   :  { %v1533_v36 = vadd.f32 %v1532_v59, %v1531_v23  ;;  %v1524_v38 = vadd.f32 %v1517_v28, %v1516_v37  ;;  %v1556_v43 = vrot.slane %v952_v40, 7 }
 0x40c   :  { %v1499_v60 = vpop.permute.xlu1 %1498  ;;  %v935_v6 = vpop.permute.xlu0 %934 }
 0x40d   :  { %v1534_v31 = vrot.slane %v1533_v36, 2  ;;  %v1525_v14 = vrot.slane %v1524_v38, 4  ;;  %v1520_v63 = vmul.f32 %v1499_v60, %v2459_v35  ;;  %v940_v54 = vmul.f32 %v935_v6, %v2438_v16 }
 0x40e   :  { %v958_v16 = vadd.f32 %v957_v61, %v956_v19  ;;  %v1557_v45 = vsel %vm544_vm15, %v1556_v43, %v946_v39 }
 0x40f   :  { %v1535_v21 = vadd.f32 %v1534_v31, %v1533_v36  ;;  %v1526_v47 = vadd.f32 %v1525_v14, %v1524_v38  ;;  %v1538_v29 = vadd.f32 %v1521_v26, %v1520_v63  ;;  %v959_v30 = vrot.slane %v940_v54, 4 }
 0x410   :  { %v1514_v4 = vpop.permute.xlu1 %1513  ;;  %v1559_v41 = vsel %vm1558_vm2, %v1556_v43, %v1557_v45  ;;  %v1560_v9 = vrot.slane %v958_v16, 6 }
 0x411   :  { %v1536_v12 = vrot.slane %v1535_v21, 1  ;;  %v1527_v52 = vrot.slane %v1526_v47, 2  ;;  %v1539_v55 = vrot.slane %v1538_v29, 4  ;;  %v1523_v15 = vmul.f32 %v1514_v4, %v2461_v27 }
 0x412   :  { %v960_v56 = vadd.f32 %v959_v30, %v940_v54  ;;  %v1561_v32 = vsel %vm546_vm12, %v1560_v9, %v1559_v41 }
 0x413   :  { %v1528_v35 = vadd.f32 %v1527_v52, %v1526_v47  ;;  %v1540_v50 = vadd.f32 %v1539_v55, %v1538_v29  ;;  %v1545_v20 = vadd.f32 %v1523_v15, %v1522_v62  ;;  %v1537_v1 = vadd.f32 %v1536_v12, %v1535_v21 }
 0x414   :  { %v961_v3 = vrot.slane %v960_v56, 2  ;;  %v1563_v24 = vsel %vm1562_vm3, %v1560_v9, %v1561_v32 }
 0x415   :  { %v1529_v5 = vrot.slane %v1528_v35, 1  ;;  %v1541_v58 = vrot.slane %v1540_v50, 2  ;;  %v1546_v8 = vrot.slane %v1545_v20, 4  ;;  %v1574_v0 = vrot.slane %v1537_v1, 7 }
 0x416   :  { %v962_v13 = vadd.f32 %v961_v3, %v960_v56 }
 0x417   :  { %v1530_v7 = vadd.f32 %v1529_v5, %v1528_v35  ;;  %v1542_v49 = vadd.f32 %v1541_v58, %v1540_v50  ;;  %v1547_v27 = vadd.f32 %v1546_v8, %v1545_v20 }
 0x418   :  { %v963_v22 = vrot.slane %v962_v13, 1 }
 0x419   :  { %v1543_v51 = vrot.slane %v1542_v49, 1  ;;  %v1548_v48 = vrot.slane %v1547_v27, 2  ;;  %v1575_v18 = vsel %vm544_vm15, %v1574_v0, %v1530_v7 }
 0x41a   :  { %v964_v46 = vadd.f32 %v963_v22, %v962_v13  ;;  %v1576_v25 = vsel %vm1558_vm2, %v1574_v0, %v1575_v18 }
 0x41b   :  { %v1544_v42 = vadd.f32 %v1543_v51, %v1542_v49  ;;  %v1549_v44 = vadd.f32 %v1548_v48, %v1547_v27 }
 0x41c   :  { %v1564_v17 = vrot.slane %v964_v46, 5 }
 0x41d   :  { %v1577_v33 = vrot.slane %v1544_v42, 6  ;;  %v1550_v10 = vrot.slane %v1549_v44, 1 }
 0x41e   :  { %v1565_v23 = vsel %vm548_vm13, %v1564_v17, %v1563_v24 }
 0x41f   :  { %v1551_v57 = vadd.f32 %v1550_v10, %v1549_v44  ;;  %v1567_v11 = vsel %vm1566_vm4, %v1564_v17, %v1565_v23  ;;  %v1578_v2 = vsel %vm546_vm12, %v1577_v33, %v1576_v25 }
 0x420   :  { %1569 = vst [vmem:[#allocation7] sm:$0xf] %v1567_v11  ;;  %v1579_v59 = vsel %vm1562_vm3, %v1577_v33, %v1578_v2 }
 0x421   :  { %v1580_v28 = vrot.slane %v1551_v57, 5 }
 0x423   :  { %v1581_v37 = vsel %vm548_vm13, %v1580_v28, %v1579_v59 }
 0x424   :  { %v1582_v53 = vsel %vm1566_vm4, %v1580_v28, %v1581_v37 }
 0x425   :  { %1584 = vst [vmem:[#allocation7 + $0x4] sm:$0xf] %v1582_v53 }
 0x426   :  { %1935 = shalt.err (!%p1932_p6)
}
 0x427   :  { %s1936_s12 = scalar_lea.hbm %s2680_s8, 128 }
 0x428   :  { %p1937_p7 = scmp.ne.s32.totalorder %s2680_s8, %s1936_s12  ;;  %p1940_p8 = scmp.lt.u32.totalorder %s1936_s12, %s2680_s8 }
 0x42a   :  { %p1942_p9 = pnand %p1940_p8, %p1937_p7 }
 0x42c   :  { %1945 = shalt.err (!%p1942_p9)
}
 0x42d   :  { %1594 = dma.vmem_to_hbm [thread:$0]  %s1592_s10, 128, %s2680_s8, [#allocation4]  }
 0x42e   :  { %1950 = dma.done.wait [#allocation4], 128  }
 0x42f   :  { %1951 = vsyncadd [#allocation4], 4294967168 }
 0x430   :  { %1598 = vsyncpa [#allocation3], 1 }
 0x431   :  { %1599 = vsyncpa [#allocation6], 1 }
 0x432   :  { %1600 = vsyncpa [#allocation4], 1 }

</bundles_post_ra>
